<compile_context>
chip_gen: v6e
topology: v6e:2x2x1
jax: 0.10.0
libtpu: 0.0.40
codegen_flags: <defaults>
</compile_context>

<pallas_src>
from functools import partial

import jax
import jax.numpy as jnp
from jax.experimental import pallas as pl
from jax.experimental.pallas import tpu as pltpu


def _round_up(a, m):
    return ((a + m - 1) // m) * m


def _tpu_generation():
    try:
        kind = jax.devices()[0].device_kind.lower()
    except Exception:
        return None
    for g in ("v7", "v6", "v5", "v4", "v3", "v2"):
        if g in kind:
            return g
    return None


def _supports_bf16_eup():
    # bf16 EUP exists on v6e / v7x; v5e and older must keep f32 exponentials.
    return _tpu_generation() not in ("v2", "v3", "v4", "v5")


def pick_tiles(n_positions, vocab_size):
    """Generation-aware (tile_n, tile_v) defaults for production shapes.

    tile_n: rows per W stream (arithmetic intensity ~ tile_n flops per W byte);
    crossover ~240 (v5e) / ~640 (v6e) / ~310 (v7x) flops/byte.
    tile_v: MXU output width / per-step-overhead amortization.
    """
    g = _tpu_generation()
    if g == "v5":
        tn, tv = 256, 512        # 4x128^2 MXU: 512-wide vocab fills all 4
    elif g == "v7":
        tn, tv = 384, 2048       # 64 MiB VMEM budget; 2x256^2 MXU
    else:
        tn, tv = 512, 1024       # v6e / unknown
    tn = min(tn, max(128, _round_up(n_positions, 128)))
    tv = min(tv, max(128, _round_up(vocab_size, 128)))
    if g == "v7":
        # need >= 2 balanced row tiles on the "parallel" axis for megacore
        while tn > 128 and pl.cdiv(n_positions, tn) < 2:
            tn //= 2
        tn = max(tn, 128)
    return tn, tv


def prepare_params(embed_table, w, b, *, tile_v):
    """One-time cast/pad of the net parameters (hoisted out of the per-step loss)."""
    V, D = embed_table.shape
    assert w.shape == (D, V) and b.shape == (V,)
    V_pad = _round_up(V, tile_v)
    emb_bf16 = embed_table.astype(jnp.bfloat16)
    w_p = jnp.pad(w.astype(jnp.bfloat16), ((0, 0), (0, V_pad - V)))
    b_p = jnp.pad(b.astype(jnp.float32), (0, V_pad - V)).reshape(1, V_pad)
    return emb_bf16, w_p, b_p


def _ce_kernel(emb_ref, w_ref, b_ref, lab_ref, out_ref, m_sc, l_sc, lab_sc, *,
               vocab_size, use_bf16_exp):
    """Grid = (row_tiles, vocab_tiles); vocab (reduction) axis innermost.

    emb_ref: (tile_n, D)   bf16  activations for tile_n token positions
    w_ref:   (D, tile_v)   bf16  projection weight slab for this vocab tile
    b_ref:   (1, tile_v)   f32   bias slab (padded cols are 0; masked in-kernel)
    lab_ref: (tile_n, 1)   i32   target ids (-1 marks padded rows)
    out_ref: (tile_n, 1)   f32   per-position NLL (written on last vocab step)
    m_sc / l_sc / lab_sc: (tile_n, 1) f32 running max / sum-exp / label logit
    """
    j = pl.program_id(1)
    tile_v = w_ref.shape[1]

    @pl.when(j == 0)
    def _():
        m_sc[...] = jnp.full_like(m_sc, -jnp.inf)
        l_sc[...] = jnp.zeros_like(l_sc)
        lab_sc[...] = jnp.zeros_like(lab_sc)

    # (tile_n, tile_v) f32 logits for this vocab tile; bias added exactly once.
    logits = jnp.dot(emb_ref[...], w_ref[...],
                     preferred_element_type=jnp.float32) + b_ref[...]

    # Mask padded vocab columns in-kernel (robust to padding placement).
    col = jax.lax.broadcasted_iota(jnp.int32, logits.shape, 1) + j * tile_v
    logits = jnp.where(col < vocab_size, logits, -1e30)

    # Online softmax recurrence: max/log-sum-exp bookkeeping stays f32;
    # the exponentials go to the EUP in bf16 on v6e/v7x, f32 on v5e.
    m_prev = m_sc[...]
    m_new = jnp.maximum(m_prev, jnp.max(logits, axis=-1, keepdims=True))
    alpha = jnp.exp(m_prev - m_new)
    z = logits - m_new
    if use_bf16_exp:
        p = jnp.exp(z.astype(jnp.bfloat16))
        p_sum = jnp.sum(p.astype(jnp.float32), axis=-1, keepdims=True)
    else:
        p = jnp.exp(z)
        p_sum = jnp.sum(p, axis=-1, keepdims=True)
    l_sc[...] = alpha * l_sc[...] + p_sum
    m_sc[...] = m_new

    # Label logit: only columns owned by this vocab tile can match.
    labels = lab_ref[...]                                        # (tile_n, 1)
    hit = col == labels
    lab_sc[...] = lab_sc[...] + jnp.sum(
        jnp.where(hit, logits, 0.0), axis=-1, keepdims=True)

    @pl.when(j == pl.num_programs(1) - 1)
    def _():
        lse = m_sc[...] + jnp.log(l_sc[...])
        valid = lab_ref[...] >= 0                  # padded rows contribute 0
        out_ref[...] = jnp.where(valid, lse - lab_sc[...], 0.0)


def autoregressive_wrapper_loss(x, embed_bf16, w_p, b_p, *, vocab_size,
                                tile_n, tile_v):
    """Forward pass of AutoregressiveWrapper: mean next-token cross-entropy.

    x: (B, T) int32 tokens.  embed_bf16 / w_p / b_p: outputs of prepare_params
    (bf16 embedding table, bf16 weight padded to a tile_v multiple, f32 bias).
    Tile guidance: use pick_tiles(N, V) for production shapes.
    """
    B, T = x.shape
    D = embed_bf16.shape[1]
    V_pad = w_p.shape[1]
    assert V_pad % tile_v == 0 and tile_n % 8 == 0 and tile_v % 128 == 0

    x_inp, x_labels = x[:, :-1], x[:, 1:]
    N = B * (T - 1)
    n_row = pl.cdiv(N, tile_n)
    n_vocab = V_pad // tile_v
    N_pad = n_row * tile_n

    # --- glue: embedding gather directly into the padded (N_pad, D) layout ---
    # TODO(synk): fuse the gather into the kernel (scalar-prefetch ids + DMA
    # gather on embed_bf16) to remove the (N_pad, D) HBM round trip entirely.
    tok = jnp.pad(x_inp.reshape(-1), (0, N_pad - N))           # pad with id 0
    emb = jnp.take(embed_bf16, tok, axis=0)                    # (N_pad, D) bf16
    labels = jnp.pad(x_labels.reshape(-1).astype(jnp.int32), (0, N_pad - N),
                     constant_values=-1).reshape(N_pad, 1)

    # W is re-streamed once per row tile -> reflect that in the cost estimate.
    cost = pl.CostEstimate(
        flops=2 * N_pad * D * V_pad,
        transcendentals=N_pad * V_pad,
        bytes_accessed=int(n_row * D * V_pad * 2      # weight re-streamed
                           + n_row * V_pad * 4        # bias re-streamed
                           + N_pad * D * 2            # activations once
                           + N_pad * 4 + N_pad * 4),  # labels in, NLL out
    )

    # VMEM budget: double-buffered emb/W/bias/labels/out blocks (lane/sublane
    # padded) + f32 logits/exp intermediates, with headroom.  Cap below the
    # physical VMEM of the smallest target (v7x: 64 MiB).
    vmem_est = (2 * tile_n * D * 2
                + 2 * D * tile_v * 2
                + 2 * 8 * tile_v * 4
                + 4 * tile_n * 128 * 4
                + 3 * tile_n * 128 * 4
                + 3 * tile_n * tile_v * 4)
    cap = (56 << 20) if _tpu_generation() == "v7" else (100 << 20)
    vmem_limit = max(32 << 20, min(vmem_est + (8 << 20), cap))

    kernel = partial(_ce_kernel, vocab_size=vocab_size,
                     use_bf16_exp=_supports_bf16_eup())

    per_row_nll = pl.pallas_call(
        kernel,
        out_shape=jax.ShapeDtypeStruct((N_pad, 1), jnp.float32),
        grid_spec=pltpu.PrefetchScalarGridSpec(
            num_scalar_prefetch=0,
            grid=(n_row, n_vocab),                 # vocab (reduction) axis last
            in_specs=[
                pl.BlockSpec((tile_n, D), lambda i, j: (i, 0)),    # activations
                pl.BlockSpec((D, tile_v), lambda i, j: (0, j)),    # weight slab
                pl.BlockSpec((1, tile_v), lambda i, j: (0, j)),    # bias slab
                pl.BlockSpec((tile_n, 1), lambda i, j: (i, 0)),    # labels
            ],
            out_specs=pl.BlockSpec((tile_n, 1), lambda i, j: (i, 0)),
            scratch_shapes=[
                pltpu.VMEM((tile_n, 1), jnp.float32),   # running max
                pltpu.VMEM((tile_n, 1), jnp.float32),   # running sum-exp
                pltpu.VMEM((tile_n, 1), jnp.float32),   # label logit
            ],
        ),
        compiler_params=pltpu.CompilerParams(
            dimension_semantics=("parallel", "arbitrary"),
            vmem_limit_bytes=int(vmem_limit)),
        cost_estimate=cost,
    )(emb, w_p, b_p, labels)

    return jnp.sum(per_row_nll) / jnp.float32(N)


def _reference_loss(x, embed_table, w, b):
    """Pure-JAX f32 reference (matches F.cross_entropy with mean reduction)."""
    x_inp, x_labels = x[:, :-1], x[:, 1:]
    emb = jnp.take(embed_table, x_inp, axis=0)                 # (B, T-1, D)
    logits = emb @ w + b                                       # (B, T-1, V)
    logp = jax.nn.log_softmax(logits, axis=-1)
    nll = -jnp.take_along_axis(logp, x_labels[..., None], axis=-1)
    return jnp.mean(nll)


if __name__ == "__main__":
    # Small demo shapes. Tiles are deliberately small (128 / 256) so that the
    # multi-row-tile AND multi-vocab-tile (online softmax) code paths are both
    # exercised:  N = B*(T-1) = 198 -> 2 row tiles of 128;  V = 500 -> padded
    # to 512 -> 2 vocab tiles of 256.  Production shapes should use
    # pick_tiles(N, V) for the generation-tuned (much larger) defaults.
    B, T = 2, 100
    D, V = 128, 500
    tile_n, tile_v = 128, 256

    key = jax.random.PRNGKey(0)
    k_tok, k_emb, k_w, k_b = jax.random.split(key, 4)

    x = jax.random.randint(k_tok, (B, T), 0, V, dtype=jnp.int32)
    embed_table = jax.random.normal(k_emb, (V, D), jnp.float32)
    w = jax.random.normal(k_w, (D, V), jnp.float32) / jnp.sqrt(jnp.float32(D))
    b = jax.random.normal(k_b, (V,), jnp.float32) * 0.1

    # One-time parameter cast/pad (hoisted out of the per-step loss).
    emb_bf16, w_p, b_p = prepare_params(embed_table, w, b, tile_v=tile_v)

    loss_fn = jax.jit(partial(autoregressive_wrapper_loss, vocab_size=V,
                              tile_n=tile_n, tile_v=tile_v))
    loss = jax.block_until_ready(loss_fn(x, emb_bf16, w_p, b_p))
    ref = jax.block_until_ready(_reference_loss(x, embed_table, w, b))

    # bf16 MXU inputs (and bf16 EUP on v6e/v7x) -> relaxed tolerance vs f32 ref.
    assert jnp.allclose(loss, ref, rtol=2e-2, atol=2e-2), (loss, ref)

    # TODO(synk): generate() (autoregressive top-k / multinomial sampling loop)
    # is inference-time control flow, not part of forward(); not implemented.
    print("KERNEL_OK")
</pallas_src>

<mosaic_0001>
module attributes {stable_mosaic.version = 11 : i64} {
  func.func @_ce_kernel(%arg0: i32, %arg1: i32, %arg2: memref<128x128xbf16, #tpu.memory_space<vmem>>, %arg3: memref<128x256xbf16, #tpu.memory_space<vmem>>, %arg4: memref<1x256xf32, #tpu.memory_space<vmem>>, %arg5: memref<128x1xi32, #tpu.memory_space<vmem>>, %arg6: memref<128x1xf32, #tpu.memory_space<vmem>>, %arg7: memref<128x1xf32, #tpu.memory_space<vmem>>, %arg8: memref<128x1xf32, #tpu.memory_space<vmem>>, %arg9: memref<128x1xf32, #tpu.memory_space<vmem>>) attributes {dimension_semantics = [#tpu.dimension_semantics<parallel>, #tpu.dimension_semantics<arbitrary>], iteration_bounds = array<i64: 2, 2>, scalar_prefetch = 0 : i64, scratch_operands = 3 : i64, tpu.core_type = #tpu.core_type<tc>, window_params = [{transform_indices = @transform_0, window_bounds = array<i64: 128, 128>}, {transform_indices = @transform_1, window_bounds = array<i64: 128, 256>}, {transform_indices = @transform_2, window_bounds = array<i64: 1, 256>}, {transform_indices = @transform_3, window_bounds = array<i64: 128, 1>}, {transform_indices = @transform_4, window_bounds = array<i64: 128, 1>}]} {
    %c0_i32 = arith.constant 0 : i32
    %0 = arith.cmpi eq, %arg1, %c0_i32 : i32
    %1 = arith.extui %0 : i1 to i32
    %c0_i32_0 = arith.constant 0 : i32
    %2 = arith.cmpi ne, %1, %c0_i32_0 : i32
    scf.if %2 {
      %cst_26 = arith.constant 0xFF800000 : f32
      %48 = vector.broadcast %cst_26 : f32 to vector<128x1xf32>
      %c0_27 = arith.constant 0 : index
      %c0_28 = arith.constant 0 : index
      %49 = vector.load %arg7[%c0_27, %c0_28] : memref<128x1xf32, #tpu.memory_space<vmem>>, vector<128x1xf32>
      tpu.vector_store %arg7[%c0_27, %c0_28], %48 {strides = array<i32>} : memref<128x1xf32, #tpu.memory_space<vmem>>, vector<128x1xf32>,
      %cst_29 = arith.constant 0.000000e+00 : f32
      %50 = vector.broadcast %cst_29 : f32 to vector<128x1xf32>
      %c0_30 = arith.constant 0 : index
      %c0_31 = arith.constant 0 : index
      %51 = vector.load %arg8[%c0_30, %c0_31] : memref<128x1xf32, #tpu.memory_space<vmem>>, vector<128x1xf32>
      tpu.vector_store %arg8[%c0_30, %c0_31], %50 {strides = array<i32>} : memref<128x1xf32, #tpu.memory_space<vmem>>, vector<128x1xf32>,
      %cst_32 = arith.constant 0.000000e+00 : f32
      %52 = vector.broadcast %cst_32 : f32 to vector<128x1xf32>
      %c0_33 = arith.constant 0 : index
      %c0_34 = arith.constant 0 : index
      %53 = vector.load %arg9[%c0_33, %c0_34] : memref<128x1xf32, #tpu.memory_space<vmem>>, vector<128x1xf32>
      tpu.vector_store %arg9[%c0_33, %c0_34], %52 {strides = array<i32>} : memref<128x1xf32, #tpu.memory_space<vmem>>, vector<128x1xf32>,
    } else {
    }
    %c0 = arith.constant 0 : index
    %c0_1 = arith.constant 0 : index
    %3 = vector.load %arg2[%c0, %c0_1] : memref<128x128xbf16, #tpu.memory_space<vmem>>, vector<128x128xbf16>
    %c0_2 = arith.constant 0 : index
    %c0_3 = arith.constant 0 : index
    %4 = vector.load %arg3[%c0_2, %c0_3] : memref<128x256xbf16, #tpu.memory_space<vmem>>, vector<128x256xbf16>
    %cst = arith.constant dense<0.000000e+00> : vector<128x256xf32>
    %5 = tpu.matmul %3, %4, %cst {dimension_numbers = #tpu.dot_dimension_numbers<[1], [0], [0], [1], [0, 0, 1, 1], [], []>} : vector<128x128xbf16>, vector<128x256xbf16>, vector<128x256xf32> -> vector<128x256xf32>
    %c0_4 = arith.constant 0 : index
    %c0_5 = arith.constant 0 : index
    %6 = vector.load %arg4[%c0_4, %c0_5] : memref<1x256xf32, #tpu.memory_space<vmem>>, vector<1x256xf32>
    %7 = vector.broadcast %6 : vector<1x256xf32> to vector<128x256xf32>
    %8 = arith.addf %5, %7 : vector<128x256xf32>
    %9 = tpu.iota {dimensions = array<i32: 1>} : vector<128x256xi32>
    %c256_i32 = arith.constant 256 : i32
    %10 = arith.muli %arg1, %c256_i32 : i32
    %11 = vector.broadcast %10 : i32 to vector<128x256xi32>
    %12 = arith.addi %9, %11 : vector<128x256xi32>
    %c500_i32 = arith.constant 500 : i32
    %13 = vector.broadcast %c500_i32 : i32 to vector<128x256xi32>
    %14 = arith.cmpi slt, %12, %13 : vector<128x256xi32>
    %cst_6 = arith.constant -1.000000e+30 : f32
    %15 = vector.broadcast %cst_6 : f32 to vector<128x256xf32>
    %16 = arith.select %14, %8, %15 : vector<128x256xi1>, vector<128x256xf32>
    %c0_7 = arith.constant 0 : index
    %c0_8 = arith.constant 0 : index
    %17 = vector.load %arg7[%c0_7, %c0_8] : memref<128x1xf32, #tpu.memory_space<vmem>>, vector<128x1xf32>
    %cst_9 = arith.constant dense<0xFF800000> : vector<128xf32>
    %18 = vector.multi_reduction <maximumf>, %16, %cst_9 [1] : vector<128x256xf32> to vector<128xf32>
    %19 = vector.shape_cast %18 : vector<128xf32> to vector<128x1xf32>
    %20 = arith.maximumf %17, %19 : vector<128x1xf32>
    %21 = arith.subf %17, %20 : vector<128x1xf32>
    %22 = math.exp %21 : vector<128x1xf32>
    %23 = vector.broadcast %20 : vector<128x1xf32> to vector<128x256xf32>
    %24 = arith.subf %16, %23 : vector<128x256xf32>
    %25 = arith.truncf %24 : vector<128x256xf32> to vector<128x256xbf16>
    %26 = math.exp %25 : vector<128x256xbf16>
    %27 = arith.extf %26 : vector<128x256xbf16> to vector<128x256xf32>
    %cst_10 = arith.constant dense<0.000000e+00> : vector<128xf32>
    %28 = vector.multi_reduction <add>, %27, %cst_10 [1] : vector<128x256xf32> to vector<128xf32>
    %29 = vector.shape_cast %28 : vector<128xf32> to vector<128x1xf32>
    %c0_11 = arith.constant 0 : index
    %c0_12 = arith.constant 0 : index
    %30 = vector.load %arg8[%c0_11, %c0_12] : memref<128x1xf32, #tpu.memory_space<vmem>>, vector<128x1xf32>
    %31 = arith.mulf %22, %30 : vector<128x1xf32>
    %32 = arith.addf %31, %29 : vector<128x1xf32>
    %c0_13 = arith.constant 0 : index
    %c0_14 = arith.constant 0 : index
    %33 = vector.load %arg8[%c0_13, %c0_14] : memref<128x1xf32, #tpu.memory_space<vmem>>, vector<128x1xf32>
    tpu.vector_store %arg8[%c0_13, %c0_14], %32 {strides = array<i32>} : memref<128x1xf32, #tpu.memory_space<vmem>>, vector<128x1xf32>,
    %c0_15 = arith.constant 0 : index
    %c0_16 = arith.constant 0 : index
    %34 = vector.load %arg7[%c0_15, %c0_16] : memref<128x1xf32, #tpu.memory_space<vmem>>, vector<128x1xf32>
    tpu.vector_store %arg7[%c0_15, %c0_16], %20 {strides = array<i32>} : memref<128x1xf32, #tpu.memory_space<vmem>>, vector<128x1xf32>,
    %c0_17 = arith.constant 0 : index
    %c0_18 = arith.constant 0 : index
    %35 = vector.load %arg5[%c0_17, %c0_18] : memref<128x1xi32, #tpu.memory_space<vmem>>, vector<128x1xi32>
    %36 = vector.broadcast %35 : vector<128x1xi32> to vector<128x256xi32>
    %37 = arith.cmpi eq, %12, %36 : vector<128x256xi32>
    %c0_19 = arith.constant 0 : index
    %c0_20 = arith.constant 0 : index
    %38 = vector.load %arg9[%c0_19, %c0_20] : memref<128x1xf32, #tpu.memory_space<vmem>>, vector<128x1xf32>
    %cst_21 = arith.constant 0.000000e+00 : f32
    %39 = vector.broadcast %cst_21 : f32 to vector<128x256xf32>
    %40 = arith.select %37, %16, %39 : vector<128x256xi1>, vector<128x256xf32>
    %cst_22 = arith.constant dense<0.000000e+00> : vector<128xf32>
    %41 = vector.multi_reduction <add>, %40, %cst_22 [1] : vector<128x256xf32> to vector<128xf32>
    %42 = vector.shape_cast %41 : vector<128xf32> to vector<128x1xf32>
    %43 = arith.addf %38, %42 : vector<128x1xf32>
    %c0_23 = arith.constant 0 : index
    %c0_24 = arith.constant 0 : index
    %44 = vector.load %arg9[%c0_23, %c0_24] : memref<128x1xf32, #tpu.memory_space<vmem>>, vector<128x1xf32>
    tpu.vector_store %arg9[%c0_23, %c0_24], %43 {strides = array<i32>} : memref<128x1xf32, #tpu.memory_space<vmem>>, vector<128x1xf32>,
    %c1_i32 = arith.constant 1 : i32
    %45 = arith.cmpi eq, %arg1, %c1_i32 : i32
    %46 = arith.extui %45 : i1 to i32
    %c0_i32_25 = arith.constant 0 : i32
    %47 = arith.cmpi ne, %46, %c0_i32_25 : i32
    scf.if %47 {
      %c0_26 = arith.constant 0 : index
      %c0_27 = arith.constant 0 : index
      %48 = vector.load %arg7[%c0_26, %c0_27] : memref<128x1xf32, #tpu.memory_space<vmem>>, vector<128x1xf32>
      %c0_28 = arith.constant 0 : index
      %c0_29 = arith.constant 0 : index
      %49 = vector.load %arg8[%c0_28, %c0_29] : memref<128x1xf32, #tpu.memory_space<vmem>>, vector<128x1xf32>
      %50 = math.log %49 : vector<128x1xf32>
      %51 = arith.addf %48, %50 : vector<128x1xf32>
      %c0_30 = arith.constant 0 : index
      %c0_31 = arith.constant 0 : index
      %52 = vector.load %arg5[%c0_30, %c0_31] : memref<128x1xi32, #tpu.memory_space<vmem>>, vector<128x1xi32>
      %c0_i32_32 = arith.constant 0 : i32
      %53 = vector.broadcast %c0_i32_32 : i32 to vector<128x1xi32>
      %54 = arith.cmpi sge, %52, %53 : vector<128x1xi32>
      %c0_33 = arith.constant 0 : index
      %c0_34 = arith.constant 0 : index
      %55 = vector.load %arg9[%c0_33, %c0_34] : memref<128x1xf32, #tpu.memory_space<vmem>>, vector<128x1xf32>
      %56 = arith.subf %51, %55 : vector<128x1xf32>
      %cst_35 = arith.constant 0.000000e+00 : f32
      %57 = vector.broadcast %cst_35 : f32 to vector<128x1xf32>
      %58 = arith.select %54, %56, %57 : vector<128x1xi1>, vector<128x1xf32>
      %c0_36 = arith.constant 0 : index
      %c0_37 = arith.constant 0 : index
      %59 = vector.load %arg6[%c0_36, %c0_37] : memref<128x1xf32, #tpu.memory_space<vmem>>, vector<128x1xf32>
      tpu.vector_store %arg6[%c0_36, %c0_37], %58 {strides = array<i32>} : memref<128x1xf32, #tpu.memory_space<vmem>>, vector<128x1xf32>,
    } else {
    }
    return
  }
  func.func @transform_0(%arg0: i32, %arg1: i32) -> (i32, i32) {
    %c0_i32 = arith.constant 0 : i32
    %c0_i32_0 = arith.constant 0 : i32
    return %arg0, %c0_i32 : i32, i32
  }
  func.func @transform_1(%arg0: i32, %arg1: i32) -> (i32, i32) {
    %c0_i32 = arith.constant 0 : i32
    %c0_i32_0 = arith.constant 0 : i32
    return %c0_i32, %arg1 : i32, i32
  }
  func.func @transform_2(%arg0: i32, %arg1: i32) -> (i32, i32) {
    %c0_i32 = arith.constant 0 : i32
    %c0_i32_0 = arith.constant 0 : i32
    return %c0_i32, %arg1 : i32, i32
  }
  func.func @transform_3(%arg0: i32, %arg1: i32) -> (i32, i32) {
    %c0_i32 = arith.constant 0 : i32
    %c0_i32_0 = arith.constant 0 : i32
    return %arg0, %c0_i32 : i32, i32
  }
  func.func @transform_4(%arg0: i32, %arg1: i32) -> (i32, i32) {
    %c0_i32 = arith.constant 0 : i32
    %c0_i32_0 = arith.constant 0 : i32
    return %arg0, %c0_i32 : i32, i32
  }
}

</mosaic_0001>

<bundles_post_ra>
// kernel: autoregressive_wrapper_loss.1
= control target key start
LH: loop header
LB: loop body
LE: loop exit
PB: predicated region body
PF: predicated region fallthrough
CT: control target
= control target key end

     0   :  { %s2062_s15 = smov 0   ;;  %s2064_s16 = smov 0   ;;  %s2988_s0 = inlined_call_operand.vmem [shape: bf16[256,128], index: 0, kind: input, shape index: {}]   ;;  %s2989_s1 = inlined_call_operand.vmem [shape: bf16[128,512], index: 1, kind: input, shape index: {}]   ;;  %s2990_s2 = inlined_call_operand.vmem [shape: f32[1,512], index: 2, kind: input, shape index: {}]   ;;  %s2991_s3 = inlined_call_operand.vmem [shape: s32[256,1], index: 3, kind: input, shape index: {}]   ;;  %s2992_s4 = inlined_call_operand.vmem [shape: f32[256,1], index: 4, kind: output, shape index: {}]  }
   0x1   :  { %s2066_s17 = smov 0   ;;  %s2068_s18 = smov 0  }
   0x2   :  { %s2070_s19 = smov 0   ;;  %s2072_s20 = smov 0  }
   0x3   :  { %s2074_s21 = smov 0  }
   0x4 LB: > { %s23_s22 = sadd.s32 1, %s2024_s19  ;;  %s26_s23 = sadd.s32 1, %s2028_s20  ;;  %s2032_s21 = sphi %s2074_s21, %s14_s21   ;;  %s2028_s20 = sphi %s2072_s20, %s3088_s20   ;;  %s2024_s19 = sphi %s2070_s19, %s3087_s19   ;;  %s2020_s18 = sphi %s2068_s18, %s3086_s18   ;;  %s2016_s17 = sphi %s2066_s17, %s3085_s17   ;;  %s2012_s16 = sphi %s2064_s16, %s3084_s16   ;;  %s2008_s15 = sphi %s2062_s15, %s3083_s15  }
   0x5   : > { %p24_p0 = scmp.ge.s32.totalorder %s23_s22, 2  ;;  %s59_s24 = sadd.s32 1, %s2012_s16 }
   0x6   : > { %p66_p1 = scmp.ne.s32.totalorder %s2012_s16, %s2008_s15  ;;  %p67_p2 = scmp.eq.s32.totalorder %s2032_s21, 0 }
   0x7   : > { %s3090_s22 = smov (%p24_p0, %s23_s22), 0  ;;  %s3092_s23 = smov (!%p24_p0, %s26_s23), %s2028_s20 }
   0x8   : > { %s56_s25 = ssub.s32 %s2024_s19, %s3090_s22  ;;  %p68_p3 = por %p67_p2, %p66_p1 }
   0x9   : > { %p28_p4 = scmp.ge.s32.totalorder %s3092_s23, 2  ;;  %p57_p5 = scmp.eq.s32.totalorder %s56_s25, 0 }
   0xa   : > { %p1730_p6 = scmp.ge.s32.totalorder %s2032_s21, 4 }
   0xb   : > { %s3094_s23 = smov (%p28_p4, %s3092_s23), 0 }
   0xc   : > { %s2111_s26 = scalar_select %p57_p5, %s2012_s16, %s59_s24  }
   0xd   : > { %170 = sbr.rel (%p1730_p6) target bundleno = 30 (0x1e), region = 16 }
  0x12   : > { %182 = sbr.rel (!%p68_p3) target bundleno = 30 (0x1e), region = 24  ;;  %s184_s27 = sand.u32 (%p68_p3), 1, %s2012_s16  }
  0x13   : > { %s1772_s28 = sshll.u32 (%p68_p3), %s2024_s19, 3  ;;  %s1731_s29 = sshll.u32 (%p68_p3), %s184_s27, 7 }
  0x14   : > { %s2119_s6 = scalar_lea.vmem (%p68_p3), %s2989_s1, %s1772_s28  ;;  %s186_s7 = scalar_lea.vmem (%p68_p3), [#allocation5], %s1731_s29 }
  0x15   : > { %v248_v0 = vld [vmem:[%s2119_s6] sm:$0xff] (%p68_p3)  ;;  %v250_v1 = vld [vmem:[%s2119_s6 + $0x10] sm:$0xff] (%p68_p3) }
  0x16   : > { %v252_v2 = vld [vmem:[%s2119_s6 + $0x20] sm:$0xff] (%p68_p3)  ;;  %249 = vst [vmem:[%s186_s7] sm:$0xff] (%p68_p3), %v248_v0  ;;  %251 = vst [vmem:[%s186_s7 + $0x8] sm:$0xff] (%p68_p3), %v250_v1  ;;  %v254_v3 = vld [vmem:[%s2119_s6 + $0x30] sm:$0xff] (%p68_p3) }
  0x17   : > { %253 = vst [vmem:[%s186_s7 + $0x10] sm:$0xff] %v252_v2  ;;  %v256_v4 = vld [vmem:[%s2119_s6 + $0x40] sm:$0xff]  ;;  %v258_v5 = vld [vmem:[%s2119_s6 + $0x50] sm:$0xff]  ;;  %255 = vst [vmem:[%s186_s7 + $0x18] sm:$0xff] %v254_v3 }
  0x18   : > { %257 = vst [vmem:[%s186_s7 + $0x20] sm:$0xff] %v256_v4  ;;  %259 = vst [vmem:[%s186_s7 + $0x28] sm:$0xff] %v258_v5  ;;  %v260_v6 = vld [vmem:[%s2119_s6 + $0x60] sm:$0xff]  ;;  %v262_v7 = vld [vmem:[%s2119_s6 + $0x70] sm:$0xff] }
  0x19   : > { %v264_v8 = vld [vmem:[%s2119_s6 + $0x80] sm:$0xff]  ;;  %261 = vst [vmem:[%s186_s7 + $0x30] sm:$0xff] %v260_v6  ;;  %263 = vst [vmem:[%s186_s7 + $0x38] sm:$0xff] %v262_v7  ;;  %v266_v9 = vld [vmem:[%s2119_s6 + $0x90] sm:$0xff] }
  0x1a   : > { %265 = vst [vmem:[%s186_s7 + $0x40] sm:$0xff] %v264_v8  ;;  %v268_v10 = vld [vmem:[%s2119_s6 + $0xa0] sm:$0xff]  ;;  %v270_v11 = vld [vmem:[%s2119_s6 + $0xb0] sm:$0xff]  ;;  %267 = vst [vmem:[%s186_s7 + $0x48] sm:$0xff] %v266_v9 }
  0x1b   : > { %269 = vst [vmem:[%s186_s7 + $0x50] sm:$0xff] %v268_v10  ;;  %271 = vst [vmem:[%s186_s7 + $0x58] sm:$0xff] %v270_v11  ;;  %v272_v12 = vld [vmem:[%s2119_s6 + $0xc0] sm:$0xff]  ;;  %v274_v13 = vld [vmem:[%s2119_s6 + $0xd0] sm:$0xff] }
  0x1c   : > { %v276_v14 = vld [vmem:[%s2119_s6 + $0xe0] sm:$0xff]  ;;  %273 = vst [vmem:[%s186_s7 + $0x60] sm:$0xff] %v272_v12  ;;  %275 = vst [vmem:[%s186_s7 + $0x68] sm:$0xff] %v274_v13  ;;  %v278_v15 = vld [vmem:[%s2119_s6 + $0xf0] sm:$0xff] }
  0x1d   : > { %277 = vst [vmem:[%s186_s7 + $0x70] sm:$0xff] %v276_v14  ;;  %279 = vst [vmem:[%s186_s7 + $0x78] sm:$0xff] %v278_v15 }
  0x1e PF: > { %p1734_p7 = scmp.ge.s32.totalorder %s2032_s21, 1  ;;  %p301_p8 = scmp.lt.s32.totalorder %s2032_s21, 5 }
  0x20   : > { %p302_p9 = pnand %p1734_p7, %p301_p8 }
  0x22   : > { %305 = sbr.rel (%p302_p9) target bundleno = 898 (0x382), region = 70 }
  0x27   : > { %s308_s8 = sand.u32 1, %s2008_s15   ;;  %s1736_s9 = sshll.u32 %s2020_s18, 4 }
  0x28   : > { %s1735_s10 = sshll.u32 %s308_s8, 7  ;;  %p348_p10 = scmp.lt.s32.totalorder %s1736_s9, 31 }
  0x29   : > { %s1738_s11 = sshll.u32 %s2016_s17, 1  ;;  %s2163_s8 = scalar_lea.vmem [#allocation5], %s1735_s10 }
  0x2a   : > { %s3096_s9 = smov (!%p348_p10, %s1736_s9), 31  ;;  %p355_p11 = scmp.lt.s32.totalorder %s1738_s11, 3 }
  0x2b   : > { %s1737_s12 = sshll.u32 %s3096_s9, 2  ;;  %s1740_s13 = sshll.u32 %s3096_s9, 3 }
  0x2c   : > { %s2145_s25 = scalar_lea.vmem %s2988_s0, %s1737_s12  ;;  %s2150_s29 = scalar_lea.vmem %s2991_s3, %s1740_s13 }
  0x2d   : > { %s3098_s11 = smov (!%p355_p11, %s1738_s11), 3  ;;  %s2157_s30 = scalar_lea.vmem %s2992_s4, %s1740_s13 }
  0x2e   : > { %s357_s7 = scalar_lea.vmem %s2990_s2, %s3098_s11  ;;  %p1743_p12 = scmp.ne.s32.totalorder %s2016_s17, 0 }
  0x30   : > { %375 = sbr.rel (%p1743_p12) target bundleno = 78 (0x4e), region = 78 }
  0x35   : > { %vm376_vm0 = vcmask 7168   ;;  %v2034_v16 = vmov -inf   ;;  %v2035_v17 = vmov 0.0  }
  0x36   : > { %377 = vst.msk [vmem:[#allocation2] sm:$0xff] %vm376_vm0, %v2034_v16  ;;  %378 = vst.msk [vmem:[#allocation2 + $0x8] sm:$0xff] %vm376_vm0, %v2034_v16 }
  0x37   : > { %379 = vst.msk [vmem:[#allocation2 + $0x10] sm:$0xff] %vm376_vm0, %v2034_v16  ;;  %380 = vst.msk [vmem:[#allocation2 + $0x18] sm:$0xff] %vm376_vm0, %v2034_v16 }
  0x38   : > { %381 = vst.msk [vmem:[#allocation2 + $0x20] sm:$0xff] %vm376_vm0, %v2034_v16  ;;  %382 = vst.msk [vmem:[#allocation2 + $0x28] sm:$0xff] %vm376_vm0, %v2034_v16 }
  0x39   : > { %383 = vst.msk [vmem:[#allocation2 + $0x30] sm:$0xff] %vm376_vm0, %v2034_v16  ;;  %384 = vst.msk [vmem:[#allocation2 + $0x38] sm:$0xff] %vm376_vm0, %v2034_v16 }
  0x3a   : > { %385 = vst.msk [vmem:[#allocation2 + $0x40] sm:$0xff] %vm376_vm0, %v2034_v16  ;;  %386 = vst.msk [vmem:[#allocation2 + $0x48] sm:$0xff] %vm376_vm0, %v2034_v16 }
  0x3b   : > { %387 = vst.msk [vmem:[#allocation2 + $0x50] sm:$0xff] %vm376_vm0, %v2034_v16  ;;  %388 = vst.msk [vmem:[#allocation2 + $0x58] sm:$0xff] %vm376_vm0, %v2034_v16 }
  0x3c   : > { %389 = vst.msk [vmem:[#allocation2 + $0x60] sm:$0xff] %vm376_vm0, %v2034_v16  ;;  %390 = vst.msk [vmem:[#allocation2 + $0x68] sm:$0xff] %vm376_vm0, %v2034_v16 }
  0x3d   : > { %391 = vst.msk [vmem:[#allocation2 + $0x70] sm:$0xff] %vm376_vm0, %v2034_v16  ;;  %392 = vst.msk [vmem:[#allocation2 + $0x78] sm:$0xff] %vm376_vm0, %v2034_v16 }
  0x3e   : > { %393 = vst.msk [vmem:[#allocation3] sm:$0xff] %vm376_vm0, %v2035_v17  ;;  %394 = vst.msk [vmem:[#allocation3 + $0x8] sm:$0xff] %vm376_vm0, %v2035_v17 }
  0x3f   : > { %395 = vst.msk [vmem:[#allocation3 + $0x10] sm:$0xff] %vm376_vm0, %v2035_v17  ;;  %396 = vst.msk [vmem:[#allocation3 + $0x18] sm:$0xff] %vm376_vm0, %v2035_v17 }
  0x40   : > { %397 = vst.msk [vmem:[#allocation3 + $0x20] sm:$0xff] %vm376_vm0, %v2035_v17  ;;  %398 = vst.msk [vmem:[#allocation3 + $0x28] sm:$0xff] %vm376_vm0, %v2035_v17 }
  0x41   : > { %399 = vst.msk [vmem:[#allocation3 + $0x30] sm:$0xff] %vm376_vm0, %v2035_v17  ;;  %400 = vst.msk [vmem:[#allocation3 + $0x38] sm:$0xff] %vm376_vm0, %v2035_v17 }
  0x42   : > { %401 = vst.msk [vmem:[#allocation3 + $0x40] sm:$0xff] %vm376_vm0, %v2035_v17  ;;  %402 = vst.msk [vmem:[#allocation3 + $0x48] sm:$0xff] %vm376_vm0, %v2035_v17 }
  0x43   : > { %403 = vst.msk [vmem:[#allocation3 + $0x50] sm:$0xff] %vm376_vm0, %v2035_v17  ;;  %404 = vst.msk [vmem:[#allocation3 + $0x58] sm:$0xff] %vm376_vm0, %v2035_v17 }
  0x44   : > { %405 = vst.msk [vmem:[#allocation3 + $0x60] sm:$0xff] %vm376_vm0, %v2035_v17  ;;  %406 = vst.msk [vmem:[#allocation3 + $0x68] sm:$0xff] %vm376_vm0, %v2035_v17 }
  0x45   : > { %407 = vst.msk [vmem:[#allocation3 + $0x70] sm:$0xff] %vm376_vm0, %v2035_v17  ;;  %408 = vst.msk [vmem:[#allocation3 + $0x78] sm:$0xff] %vm376_vm0, %v2035_v17 }
  0x46   : > { %409 = vst.msk [vmem:[#allocation4] sm:$0xff] %vm376_vm0, %v2035_v17  ;;  %410 = vst.msk [vmem:[#allocation4 + $0x8] sm:$0xff] %vm376_vm0, %v2035_v17 }
  0x47   : > { %411 = vst.msk [vmem:[#allocation4 + $0x10] sm:$0xff] %vm376_vm0, %v2035_v17  ;;  %412 = vst.msk [vmem:[#allocation4 + $0x18] sm:$0xff] %vm376_vm0, %v2035_v17 }
  0x48   : > { %413 = vst.msk [vmem:[#allocation4 + $0x20] sm:$0xff] %vm376_vm0, %v2035_v17  ;;  %414 = vst.msk [vmem:[#allocation4 + $0x28] sm:$0xff] %vm376_vm0, %v2035_v17 }
  0x49   : > { %415 = vst.msk [vmem:[#allocation4 + $0x30] sm:$0xff] %vm376_vm0, %v2035_v17  ;;  %416 = vst.msk [vmem:[#allocation4 + $0x38] sm:$0xff] %vm376_vm0, %v2035_v17 }
  0x4a   : > { %417 = vst.msk [vmem:[#allocation4 + $0x40] sm:$0xff] %vm376_vm0, %v2035_v17  ;;  %418 = vst.msk [vmem:[#allocation4 + $0x48] sm:$0xff] %vm376_vm0, %v2035_v17 }
  0x4b   : > { %419 = vst.msk [vmem:[#allocation4 + $0x50] sm:$0xff] %vm376_vm0, %v2035_v17  ;;  %420 = vst.msk [vmem:[#allocation4 + $0x58] sm:$0xff] %vm376_vm0, %v2035_v17 }
  0x4c   : > { %421 = vst.msk [vmem:[#allocation4 + $0x60] sm:$0xff] %vm376_vm0, %v2035_v17  ;;  %422 = vst.msk [vmem:[#allocation4 + $0x68] sm:$0xff] %vm376_vm0, %v2035_v17 }
  0x4d   : > { %423 = vst.msk [vmem:[#allocation4 + $0x70] sm:$0xff] %vm376_vm0, %v2035_v17  ;;  %424 = vst.msk [vmem:[#allocation4 + $0x78] sm:$0xff] %vm376_vm0, %v2035_v17 }
  0x4e PF: > { %v1850_v18 = vld [vmem:[%s2163_s8 + $0x74] ss:$8 sps:$4 sm:$0xff]   ;;  %v1852_v19 = vld [vmem:[%s2163_s8 + $0x70] ss:$8 sps:$4 sm:$0xff]   ;;  %v2036_v20 = vmov 0   ;;  %v1217_v30 = vld [vmem:[%s2150_s29 + $0x8] sm:$0xff]  ;;  %v459_v52 = vlaneseq }
  0x4f   : > { %629 = vmatprep.mubr.bf16.mxu0 %v2036_v20  ;;  %669 = vmatprep.mubr.bf16.mxu1 %v2036_v20  ;;  %v1853_v21 = vld [vmem:[%s2163_s8 + $0x64] ss:$8 sps:$4 sm:$0xff]   ;;  %v1855_v22 = vld [vmem:[%s2163_s8 + $0x60] ss:$8 sps:$4 sm:$0xff]   ;;  %v1856_v23 = vld [vmem:[%s2163_s8 + $0x54] ss:$8 sps:$4 sm:$0xff]  }
  0x50   : > { %597 = vmatprep.subr.bf16.mxu0 %v1850_v18  ;;  %1773 = vmatprep.subr.bf16.mxu1 %v1850_v18  ;;  %v1858_v24 = vld [vmem:[%s2163_s8 + $0x50] ss:$8 sps:$4 sm:$0xff]   ;;  %v1859_v25 = vld [vmem:[%s2163_s8 + $0x44] ss:$8 sps:$4 sm:$0xff]   ;;  %v1861_v26 = vld [vmem:[%s2163_s8 + $0x40] ss:$8 sps:$4 sm:$0xff]  }
  0x51   : > { %598 = vmatpush1.bf16.msra.mxu0 %v1852_v19  ;;  %1781 = vmatpush1.bf16.msra.mxu1 %v1852_v19  ;;  %v1862_v27 = vld [vmem:[%s2163_s8 + $0x34] ss:$8 sps:$4 sm:$0xff]   ;;  %v1864_v28 = vld [vmem:[%s2163_s8 + $0x30] ss:$8 sps:$4 sm:$0xff]   ;;  %v1865_v29 = vld [vmem:[%s2163_s8 + $0x24] ss:$8 sps:$4 sm:$0xff]  }
  0x52   : > { %599 = vmatprep.subr.bf16.mxu0 %v1853_v21  ;;  %1774 = vmatprep.subr.bf16.mxu1 %v1853_v21  ;;  %v1867_v31 = vld [vmem:[%s2163_s8 + $0x20] ss:$8 sps:$4 sm:$0xff]   ;;  %v1868_v32 = vld [vmem:[%s2163_s8 + $0x14] ss:$8 sps:$4 sm:$0xff]   ;;  %v1870_v36 = vld [vmem:[%s2163_s8 + $0x10] ss:$8 sps:$4 sm:$0xff]  }
  0x53   : > { %1849 = vset.pattern.permute.xlu0 %v2036_v20  ;;  %1848 = vset.pattern.permute.xlu1 %v2036_v20  ;;  %v1216_v33 = vld [vmem:[%s2150_s29] sm:$0xff]  ;;  %v1218_v35 = vld [vmem:[%s2150_s29 + $0x10] sm:$0xff]  ;;  %v1219_v39 = vld [vmem:[%s2150_s29 + $0x18] sm:$0xff]  ;;  %v460_v53 = vshrl.u32 %v459_v52, 7  ;;  %v711_v54 = vand.u32 127, %v459_v52  ;;  %s1768_s9 = sshll.u32 %s2016_s17, 8 }
  0x54   : > { %1236 = vperm.xlu0 %1849, %v1217_v30   ;;  %1233 = vperm.xlu1 %1848, %v1216_v33   ;;  %v1220_v34 = vld [vmem:[%s2150_s29 + $0x20] sm:$0xff]  ;;  %v1222_v38 = vld [vmem:[%s2150_s29 + $0x30] sm:$0xff]  ;;  %v1221_v44 = vld [vmem:[%s2150_s29 + $0x28] sm:$0xff]  ;;  %v714_v58 = vstv %s1768_s9  ;;  %vm1183_vm3 = vcmask 7168   ;;  %p1769_p13 = scmp.ne.s32.totalorder %s2016_s17, 1 }
  0x55   : > { %600 = vmatpush1.bf16.msra.mxu0 %v1855_v22  ;;  %1782 = vmatpush1.bf16.msra.mxu1 %v1855_v22  ;;  %v1871_v37 = vld [vmem:[%s2163_s8 + $0x4] ss:$8 sps:$4 sm:$0xff]   ;;  %v1873_v40 = vld [vmem:[%s2163_s8] ss:$8 sps:$4 sm:$0xff]   ;;  %v1223_v45 = vld [vmem:[%s2150_s29 + $0x38] sm:$0xff]  ;;  %v461_v55 = vsub.s32 0, %v460_v53  ;;  %v2265_v61 = vadd.s32 %v714_v58, %v711_v54 }
  0x56   : > { %601 = vmatprep.subr.bf16.mxu0 %v1856_v23  ;;  %1775 = vmatprep.subr.bf16.mxu1 %v1856_v23  ;;  %v1874_v41 = vld [vmem:[%s2145_s25] sm:$0xff]   ;;  %v1876_v46 = vld [vmem:[%s2145_s25 + $0x8] sm:$0xff]   ;;  %v1878_v48 = vld [vmem:[%s2145_s25 + $0x10] sm:$0xff]   ;;  %v712_v56 = vadd.s32 128, %v711_v54  ;;  %v465_v59 = vsub.s32 1, %v460_v53 }
  0x57   : > { %v1875_v42 = vld [vmem:[%s2145_s25 + $0x20] sm:$0xff]   ;;  %v1877_v47 = vld [vmem:[%s2145_s25 + $0x28] sm:$0xff]   ;;  %v1879_v49 = vld [vmem:[%s2145_s25 + $0x30] sm:$0xff]   ;;  %vm717_vm1 = vcmp.lt.s32.totalorder %v2265_v61, 500 }
  0x58   : > { %1245 = vperm.xlu0 %1849, %v1220_v34   ;;  %1239 = vperm.xlu1 %1848, %v1218_v35   ;;  %v1224_v43 = vld [vmem:[%s2150_s29 + $0x40] sm:$0xff]  ;;  %v1880_v50 = vld [vmem:[%s2145_s25 + $0x18] sm:$0xff]   ;;  %v2267_v62 = vadd.s32 %v714_v58, %v712_v56 }
  0x59   : > { %602 = vmatpush1.bf16.msra.mxu0 %v1858_v24  ;;  %1783 = vmatpush1.bf16.msra.mxu1 %v1858_v24  ;;  %v1881_v51 = vld [vmem:[%s2145_s25 + $0x38] sm:$0xff]   ;;  %v457_v57 = vld [vmem:[%s357_s7] sm:$0x3] }
  0x5a   : > { %603 = vmatprep.subr.bf16.mxu0 %v1859_v25  ;;  %1776 = vmatprep.subr.bf16.mxu1 %v1859_v25  ;;  %v2263_v60 = vrot.slane %v457_v57, %v461_v55  ;;  %v2269_v63 = vrot.slane %v457_v57, %v465_v59  ;;  %vm718_vm2 = vcmp.lt.s32.totalorder %v2267_v62, 500 }
  0x5c   : > { %1251 = vperm.xlu0 %1849, %v1222_v38   ;;  %1242 = vperm.xlu1 %1848, %v1219_v39  }
  0x5d   : > { %604 = vmatpush1.bf16.msra.mxu0 %v1861_v26  ;;  %1784 = vmatpush1.bf16.msra.mxu1 %v1861_v26 }
  0x5e   : > { %605 = vmatprep.subr.bf16.mxu0 %v1862_v27  ;;  %1777 = vmatprep.subr.bf16.mxu1 %v1862_v27 }
  0x60   : > { %1257 = vperm.xlu0 %1849, %v1224_v43   ;;  %1248 = vperm.xlu1 %1848, %v1221_v44  }
  0x61   : > { %606 = vmatpush1.bf16.msra.mxu0 %v1864_v28  ;;  %1785 = vmatpush1.bf16.msra.mxu1 %v1864_v28 }
  0x62   : > { %607 = vmatprep.subr.bf16.mxu0 %v1865_v29  ;;  %1778 = vmatprep.subr.bf16.mxu1 %v1865_v29 }
  0x64   : > { %1254 = vperm.xlu1 %1848, %v1223_v45  }
  0x65   : > { %608 = vmatpush1.bf16.msra.mxu0 %v1867_v31  ;;  %1786 = vmatpush1.bf16.msra.mxu1 %v1867_v31 }
  0x66   : > { %609 = vmatprep.subr.bf16.mxu0 %v1868_v32  ;;  %1779 = vmatprep.subr.bf16.mxu1 %v1868_v32 }
  0x69   : > { %610 = vmatpush1.bf16.msra.mxu0 %v1870_v36  ;;  %1787 = vmatpush1.bf16.msra.mxu1 %v1870_v36 }
  0x6a   : > { %611 = vmatprep.subr.bf16.mxu0 %v1871_v37  ;;  %1780 = vmatprep.subr.bf16.mxu1 %v1871_v37 }
  0x6d   : > { %612 = vmatpush1.bf16.msra.mxu0 %v1873_v40  ;;  %1788 = vmatpush1.bf16.msra.mxu1 %v1873_v40 }
  0x70   : > { %630 = vmatmul.mubr.bf16.vlgmr.msra.gmra.mxu0 %v1874_v41  ;;  %670 = vmatmul.mubr.bf16.vlgmr.msra.gmra.mxu1 %v1875_v42 }
  0x71   : > { %639 = vmatprep.mubr.bf16.mxu0 %v2036_v20  ;;  %679 = vmatprep.mubr.bf16.mxu1 %v2036_v20 }
  0x78   : > { %640 = vmatmul.mubr.bf16.gmra.mxu0 %v1876_v46  ;;  %680 = vmatmul.mubr.bf16.gmra.mxu1 %v1877_v47 }
  0x79   : > { %649 = vmatprep.mubr.bf16.mxu0 %v2036_v20  ;;  %689 = vmatprep.mubr.bf16.mxu1 %v2036_v20 }
  0x80   : > { %650 = vmatmul.mubr.bf16.gmra.mxu0 %v1878_v48  ;;  %690 = vmatmul.mubr.bf16.gmra.mxu1 %v1879_v49 }
  0x81   : > { %659 = vmatprep.mubr.bf16.mxu0 %v2036_v20  ;;  %699 = vmatprep.mubr.bf16.mxu1 %v2036_v20 }
  0x88   : > { %660 = vmatmul.mubr.bf16.gmra.mxu0 %v1880_v50  ;;  %700 = vmatmul.mubr.bf16.gmra.mxu1 %v1881_v51 }
 0x130   : > { %v631_v0 = vpop.f32.mrf.mxu0  ;;  %v671_v1 = vpop.f32.mrf.mxu1 }
 0x131   : > { %v632_v2 = vadd.f32 %v631_v0, %v2263_v60  ;;  %v672_v7 = vadd.f32 %v671_v1, %v2263_v60 }
 0x132   : > { %v633_v3 = vpop.f32.mrf.mxu0  ;;  %v673_v4 = vpop.f32.mrf.mxu1 }
 0x133   : > { %v634_v5 = vadd.f32 %v633_v3, %v2269_v63  ;;  %v674_v6 = vadd.f32 %v673_v4, %v2269_v63  ;;  %v2279_v10 = vsel %vm717_vm1, %v632_v2, -1e+30  ;;  %v2296_v19 = vsel %vm717_vm1, %v672_v7, -1e+30 }
 0x134   : > { %v635_v8 = vpop.f32.mrf.mxu0  ;;  %v675_v9 = vpop.f32.mrf.mxu1 }
 0x135   : > { %v2283_v11 = vsel %vm718_vm2, %v634_v5, -1e+30  ;;  %v676_v12 = vadd.f32 %v675_v9, %v2263_v60  ;;  %v2290_v16 = vsel %vm718_vm2, %v674_v6, -1e+30  ;;  %v636_v22 = vadd.f32 %v635_v8, %v2263_v60 }
 0x136   : > { %v637_v13 = vpop.f32.mrf.mxu0  ;;  %v677_v14 = vpop.f32.mrf.mxu1  ;;  %v767_v15 = vmax.f32 %v2279_v10, %v2283_v11  ;;  %v791_v29 = vmax.f32 %v2296_v19, %v2290_v16 }
 0x137   : > { %v638_v17 = vadd.f32 %v637_v13, %v2269_v63  ;;  %v678_v18 = vadd.f32 %v677_v14, %v2269_v63  ;;  %v2301_v23 = vsel %vm717_vm1, %v676_v12, -1e+30  ;;  %v2321_v36 = vsel %vm717_vm1, %v636_v22, -1e+30 }
 0x138   : > { %v641_v20 = vpop.f32.mrf.mxu0  ;;  %v681_v21 = vpop.f32.mrf.mxu1  ;;  %768 = vmax.xlane.f32.xlu0 %v767_v15 }
 0x139   : > { %v2305_v24 = vsel %vm718_vm2, %v678_v18, -1e+30  ;;  %v642_v25 = vadd.f32 %v641_v20, %v2263_v60  ;;  %v2314_v30 = vsel %vm718_vm2, %v638_v17, -1e+30  ;;  %v682_v31 = vadd.f32 %v681_v21, %v2263_v60 }
 0x13a   : > { %v643_v26 = vpop.f32.mrf.mxu0  ;;  %v683_v27 = vpop.f32.mrf.mxu1  ;;  %v794_v28 = vmax.f32 %v2301_v23, %v2305_v24  ;;  %v770_v43 = vmax.f32 %v2321_v36, %v2314_v30 }
 0x13b   : > { %v644_v32 = vadd.f32 %v643_v26, %v2269_v63  ;;  %v684_v33 = vadd.f32 %v683_v27, %v2269_v63  ;;  %v2325_v37 = vsel %vm717_vm1, %v642_v25, -1e+30  ;;  %v2338_v44 = vsel %vm717_vm1, %v682_v31, -1e+30 }
 0x13c   : > { %v685_v34 = vpop.f32.mrf.mxu1  ;;  %795 = vmax.xlane.f32.xlu1 %v794_v28  ;;  %v645_v35 = vpop.f32.mrf.mxu0  ;;  %792 = vmax.xlane.f32.xlu0 %v791_v29 }
 0x13d   : > { %v2329_v38 = vsel %vm718_vm2, %v644_v32, -1e+30  ;;  %v646_v39 = vadd.f32 %v645_v35, %v2263_v60  ;;  %v2342_v45 = vsel %vm718_vm2, %v684_v33, -1e+30  ;;  %v686_v50 = vadd.f32 %v685_v34, %v2263_v60 }
 0x13e   : > { %v647_v40 = vpop.f32.mrf.mxu0  ;;  %v687_v41 = vpop.f32.mrf.mxu1  ;;  %v773_v42 = vmax.f32 %v2325_v37, %v2329_v38  ;;  %v797_v57 = vmax.f32 %v2338_v44, %v2342_v45 }
 0x13f   : > { %v648_v46 = vadd.f32 %v647_v40, %v2269_v63  ;;  %v688_v47 = vadd.f32 %v687_v41, %v2269_v63  ;;  %v2349_v51 = vsel %vm717_vm1, %v646_v39, -1e+30  ;;  %v2369_v4 = vsel %vm717_vm1, %v686_v50, -1e+30 }
 0x140   : > { %v651_v48 = vpop.f32.mrf.mxu0  ;;  %v691_v49 = vpop.f32.mrf.mxu1  ;;  %774 = vmax.xlane.f32.xlu1 %v773_v42  ;;  %771 = vmax.xlane.f32.xlu0 %v770_v43 }
 0x141   : > { %v2353_v52 = vsel %vm718_vm2, %v648_v46, -1e+30  ;;  %v652_v53 = vadd.f32 %v651_v48, %v2263_v60  ;;  %v2362_v58 = vsel %vm718_vm2, %v688_v47, -1e+30  ;;  %v692_v59 = vadd.f32 %v691_v49, %v2263_v60 }
 0x142   : > { %v653_v54 = vpop.f32.mrf.mxu0  ;;  %v693_v55 = vpop.f32.mrf.mxu1  ;;  %v776_v56 = vmax.f32 %v2349_v51, %v2353_v52  ;;  %v800_v12 = vmax.f32 %v2369_v4, %v2362_v58 }
 0x143   : > { %v654_v0 = vadd.f32 %v653_v54, %v2269_v63  ;;  %v694_v1 = vadd.f32 %v693_v55, %v2269_v63  ;;  %v2373_v5 = vsel %vm717_vm1, %v652_v53, -1e+30  ;;  %v2386_v14 = vsel %vm717_vm1, %v692_v59, -1e+30 }
 0x144   : > { %v655_v2 = vpop.f32.mrf.mxu0  ;;  %v695_v3 = vpop.f32.mrf.mxu1  ;;  %777 = vmax.xlane.f32.xlu1 %v776_v56  ;;  %798 = vmax.xlane.f32.xlu0 %v797_v57 }
 0x145   : > { %v2377_v6 = vsel %vm718_vm2, %v654_v0, -1e+30  ;;  %v656_v7 = vadd.f32 %v655_v2, %v2263_v60  ;;  %v2390_v15 = vsel %vm718_vm2, %v694_v1, -1e+30  ;;  %v696_v20 = vadd.f32 %v695_v3, %v2263_v60 }
 0x146   : > { %v657_v8 = vpop.f32.mrf.mxu0  ;;  %v697_v9 = vpop.f32.mrf.mxu1  ;;  %v779_v13 = vmax.f32 %v2373_v5, %v2377_v6  ;;  %v803_v31 = vmax.f32 %v2386_v14, %v2390_v15 }
 0x147   : > { %v658_v17 = vadd.f32 %v657_v8, %v2269_v63  ;;  %v698_v18 = vadd.f32 %v697_v9, %v2269_v63  ;;  %v2397_v25 = vsel %vm717_vm1, %v656_v7, -1e+30  ;;  %v2421_v41 = vsel %vm717_vm1, %v696_v20, -1e+30  ;;  %v2465_v8 = vpop.permute.xlu0 %1236  ;;  %v2467_v9 = vpop.permute.xlu1 %1233 }
 0x148   : > { %801 = vmax.xlane.f32.xlu1 %v800_v12  ;;  %780 = vmax.xlane.f32.xlu0 %v779_v13  ;;  %v661_v21 = vpop.f32.mrf.mxu0  ;;  %v701_v22 = vpop.f32.mrf.mxu1  ;;  %vm1281_vm4 = vcmp.eq.s32.totalorder %v2267_v62, %v2467_v9  ;;  %vm1280_vm5 = vcmp.eq.s32.totalorder %v2265_v61, %v2467_v9  ;;  %vm1283_vm14 = vcmp.eq.s32.totalorder %v2267_v62, %v2465_v8 }
 0x149   : > { %v2401_v26 = vsel %vm718_vm2, %v658_v17, -1e+30  ;;  %v662_v27 = vadd.f32 %v661_v21, %v2263_v60  ;;  %v702_v28 = vadd.f32 %v701_v22, %v2263_v60  ;;  %v2411_v34 = vsel %vm718_vm2, %v698_v18, -1e+30  ;;  %v2481_v22 = vld [vmem:[#allocation2] sm:$0xff] }
 0x14a   : > { %v782_v29 = vmax.f32 %v2397_v25, %v2401_v26  ;;  %v663_v32 = vpop.f32.mrf.mxu0  ;;  %v703_v33 = vpop.f32.mrf.mxu1  ;;  %v806_v53 = vmax.f32 %v2421_v41, %v2411_v34  ;;  %vm1282_vm15 = vcmp.eq.s32.totalorder %v2265_v61, %v2465_v8 }
 0x14b   : > { %v2415_v35 = vsel %vm717_vm1, %v662_v27, -1e+30  ;;  %v664_v39 = vadd.f32 %v663_v32, %v2269_v63  ;;  %v704_v40 = vadd.f32 %v703_v33, %v2269_v63  ;;  %v2425_v42 = vsel %vm717_vm1, %v702_v28, -1e+30  ;;  %v2469_v12 = vpop.permute.xlu0 %1245  ;;  %v2471_v13 = vpop.permute.xlu1 %1239  ;;  %v2490_v32 = vld [vmem:[#allocation2 + $0x40] sm:$0xff] }
 0x14c   : > { %783 = vmax.xlane.f32.xlu1 %v782_v29  ;;  %804 = vmax.xlane.f32.xlu0 %v803_v31  ;;  %v665_v43 = vpop.f32.mrf.mxu0  ;;  %v705_v46 = vpop.f32.mrf.mxu1  ;;  %v2488_v31 = vld [vmem:[#allocation2 + $0x48] sm:$0xff]  ;;  %3018 = vst [vmem:[#allocation6_spill] sm:$0xff] %v2490_v32  ;;  %vm1285_vm6 = vcmp.eq.s32.totalorder %v2267_v62, %v2471_v13  ;;  %vm1284_vm7 = vcmp.eq.s32.totalorder %v2265_v61, %v2471_v13 }
 0x14d   : > { %v2429_v47 = vsel %vm718_vm2, %v664_v39, -1e+30  ;;  %v2433_v48 = vsel %vm718_vm2, %v704_v40, -1e+30  ;;  %v666_v49 = vadd.f32 %v665_v43, %v2263_v60  ;;  %v706_v50 = vadd.f32 %v705_v46, %v2263_v60 }
 0x14e   : > { %v785_v54 = vmax.f32 %v2415_v35, %v2429_v47  ;;  %v667_v55 = vpop.f32.mrf.mxu0  ;;  %v707_v56 = vpop.f32.mrf.mxu1  ;;  %v809_v60 = vmax.f32 %v2425_v42, %v2433_v48  ;;  %vm1289_vm8 = vcmp.eq.s32.totalorder %v2267_v62, %v2469_v12  ;;  %v1332_v9 = vsel %vm1284_vm7, %v2325_v37, 0.0 }
 0x14f   : > { %v2443_v57 = vsel %vm717_vm1, %v666_v49, -1e+30  ;;  %v668_v59 = vadd.f32 %v667_v55, %v2269_v63  ;;  %v708_v0 = vadd.f32 %v707_v56, %v2269_v63  ;;  %v2455_v2 = vsel %vm717_vm1, %v706_v50, -1e+30  ;;  %v2473_v17 = vpop.permute.xlu0 %1251  ;;  %v2475_v18 = vpop.permute.xlu1 %1242  ;;  %v2503_v49 = vld [vmem:[#allocation2 + $0x10] sm:$0xff]  ;;  %v2505_v50 = vld [vmem:[#allocation2 + $0x8] sm:$0xff] }
 0x150   : > { %807 = vmax.xlane.f32.xlu1 %v806_v53  ;;  %786 = vmax.xlane.f32.xlu0 %v785_v54  ;;  %3020 = vst [vmem:[#allocation8_spill] sm:$0xff] %v2503_v49  ;;  %3021 = vst [vmem:[#allocation9_spill] sm:$0xff] %v2505_v50  ;;  %v2544_v54 = vld [vmem:[#allocation2 + $0x20] sm:$0xff]  ;;  %vm1288_vm9 = vcmp.eq.s32.totalorder %v2265_v61, %v2469_v12  ;;  %vm1292_vm10 = vcmp.eq.s32.totalorder %v2265_v61, %v2473_v17 }
 0x151   : > { %v2451_v1 = vsel %vm718_vm2, %v668_v59, -1e+30  ;;  %v2459_v3 = vsel %vm718_vm2, %v708_v0, -1e+30  ;;  %3027 = vst [vmem:[#allocation15_spill] sm:$0xff] %v2544_v54  ;;  %vm1293_vm11 = vcmp.eq.s32.totalorder %v2267_v62, %v2473_v17  ;;  %v1336_v13 = vsel %vm1288_vm9, %v2373_v5, 0.0 }
 0x152   : > { %v788_v63 = vmax.f32 %v2443_v57, %v2451_v1  ;;  %v812_v7 = vmax.f32 %v2455_v2, %v2459_v3  ;;  %v1341_v12 = vsel %vm1293_vm11, %v2429_v47, 0.0  ;;  %vm1287_vm0 = vcmp.eq.s32.totalorder %v2267_v62, %v2475_v18 }
 0x153   : > { %v2477_v20 = vpop.permute.xlu0 %1257  ;;  %v2479_v21 = vpop.permute.xlu1 %1248  ;;  %vm1286_vm1 = vcmp.eq.s32.totalorder %v2265_v61, %v2475_v18 }
 0x154   : > { %810 = vmax.xlane.f32.xlu0 %v809_v60  ;;  %789 = vmax.xlane.f32.xlu1 %v788_v63  ;;  %v2523_v60 = vld [vmem:[#allocation2 + $0x18] sm:$0xff]  ;;  %v2525_v63 = vld [vmem:[#allocation2 + $0x50] sm:$0xff]  ;;  %vm1297_vm12 = vcmp.eq.s32.totalorder %v2267_v62, %v2477_v20  ;;  %vm1296_vm13 = vcmp.eq.s32.totalorder %v2265_v61, %v2477_v20  ;;  %v1330_v20 = vsel %vm1282_vm15, %v2321_v36, 0.0  ;;  %vm1291_vm2 = vcmp.eq.s32.totalorder %v2267_v62, %v2479_v21 }
 0x155   : > { %3024 = vst [vmem:[#allocation12_spill] sm:$0xff] %v2525_v63  ;;  %v1345_v17 = vsel %vm1297_vm12, %v2290_v16, 0.0  ;;  %v1334_v8 = vsel %vm1286_vm1, %v2349_v51, 0.0 }
 0x157   : > { %v2483_v27 = vpop.permute.xlu1 %1254 }
 0x158   : > { %813 = vmax.xlane.f32.xlu1 %v812_v7  ;;  %v2542_v7 = vld [vmem:[#allocation2 + $0x58] sm:$0xff] }
 0x159   : > { %3026 = vst [vmem:[#allocation14_spill] sm:$0xff] %v2542_v7 }
 0x1c1   : > { %v769_v28 = vpop.xlane.xlu0 %768 }
 0x1c2   : > { %v2486_v29 = vmax.f32 %v2481_v22, %v769_v28  ;;  %v2561_v28 = vld [vmem:[#allocation2 + $0x28] sm:$0xff] }
 0x1c4   : > { %1200 = vst.msk [vmem:[#allocation2] sm:$0xff] %vm1183_vm3, %v2486_v29  ;;  %881 = vperm.xlu0 %1849, %v2486_v29  }
 0x1c5   : > { %v796_v39 = vpop.xlane.xlu1 %795  ;;  %v793_v40 = vpop.xlane.xlu0 %792 }
 0x1c6   : > { %v2498_v43 = vmax.f32 %v2488_v31, %v796_v39  ;;  %v2501_v46 = vmax.f32 %v2490_v32, %v793_v40  ;;  %v2583_v32 = vld [vmem:[#allocation2 + $0x30] sm:$0xff] }
 0x1c7   : > { %3034 = vst [vmem:[#allocation22_spill] sm:$0xff] %v2583_v32 }
 0x1c8   : > { %3019 = vst [vmem:[#allocation7_spill] sm:$0xff] %v2501_v46  ;;  %1209 = vst.msk [vmem:[#allocation2 + $0x48] sm:$0xff] %vm1183_vm3, %v2498_v43  ;;  %926 = vperm.xlu0 %1849, %v2498_v43   ;;  %921 = vperm.xlu1 %1848, %v2501_v46  }
 0x1c9   : > { %1208 = vst.msk [vmem:[#allocation2 + $0x40] sm:$0xff] %vm1183_vm3, %v2501_v46  ;;  %v775_v55 = vpop.xlane.xlu1 %774  ;;  %v772_v56 = vpop.xlane.xlu0 %771  ;;  %v2563_v46 = vld [vmem:[#allocation2 + $0x60] sm:$0xff] }
 0x1ca   : > { %v2518_v59 = vmax.f32 %v2503_v49, %v775_v55  ;;  %v2521_v0 = vmax.f32 %v2505_v50, %v772_v56  ;;  %3030 = vst [vmem:[#allocation18_spill] sm:$0xff] %v2563_v46 }
 0x1cc   : > { %3022 = vst [vmem:[#allocation10_spill] sm:$0xff] %v2518_v59  ;;  %3023 = vst [vmem:[#allocation11_spill] sm:$0xff] %v2521_v0  ;;  %886 = vperm.xlu1 %1848, %v2521_v0  }
 0x1cd   : > { %1202 = vst.msk [vmem:[#allocation2 + $0x10] sm:$0xff] %vm1183_vm3, %v2518_v59  ;;  %1201 = vst.msk [vmem:[#allocation2 + $0x8] sm:$0xff] %vm1183_vm3, %v2521_v0  ;;  %v778_v39 = vpop.xlane.xlu1 %777  ;;  %v799_v40 = vpop.xlane.xlu0 %798  ;;  %v2602_v0 = vld [vmem:[#allocation2 + $0x38] sm:$0xff] }
 0x1ce   : > { %v2537_v55 = vmax.f32 %v2523_v60, %v778_v39  ;;  %v2540_v56 = vmax.f32 %v2525_v63, %v799_v40  ;;  %v2600_v63 = vld [vmem:[#allocation2 + $0x70] sm:$0xff]  ;;  %3038 = vst [vmem:[#allocation26_spill] sm:$0xff] %v2602_v0 }
 0x1cf   : > { %3037 = vst [vmem:[#allocation25_spill] sm:$0xff] %v2600_v63 }
 0x1d0   : > { %3025 = vst [vmem:[#allocation13_spill] sm:$0xff] %v2540_v56  ;;  %1203 = vst.msk [vmem:[#allocation2 + $0x18] sm:$0xff] %vm1183_vm3, %v2537_v55  ;;  %891 = vperm.xlu1 %1848, %v2518_v59  }
 0x1d1   : > { %1210 = vst.msk [vmem:[#allocation2 + $0x50] sm:$0xff] %vm1183_vm3, %v2540_v56  ;;  %v802_v39 = vpop.xlane.xlu1 %801  ;;  %v781_v40 = vpop.xlane.xlu0 %780 }
 0x1d2   : > { %v2556_v33 = vmax.f32 %v2542_v7, %v802_v39  ;;  %v2559_v49 = vmax.f32 %v2544_v54, %v781_v40  ;;  %v2581_v7 = vld [vmem:[#allocation2 + $0x68] sm:$0xff] }
 0x1d3   : > { %3033 = vst [vmem:[#allocation21_spill] sm:$0xff] %v2581_v7 }
 0x1d4   : > { %3028 = vst [vmem:[#allocation16_spill] sm:$0xff] %v2556_v33  ;;  %3029 = vst [vmem:[#allocation17_spill] sm:$0xff] %v2559_v49  ;;  %936 = vperm.xlu0 %1849, %v2556_v33   ;;  %931 = vperm.xlu1 %1848, %v2540_v56  }
 0x1d5   : > { %1211 = vst.msk [vmem:[#allocation2 + $0x58] sm:$0xff] %vm1183_vm3, %v2556_v33  ;;  %1204 = vst.msk [vmem:[#allocation2 + $0x20] sm:$0xff] %vm1183_vm3, %v2559_v49  ;;  %v784_v39 = vpop.xlane.xlu1 %783  ;;  %v805_v40 = vpop.xlane.xlu0 %804 }
 0x1d6   : > { %v2576_v59 = vmax.f32 %v2561_v28, %v784_v39  ;;  %v2579_v53 = vmax.f32 %v2563_v46, %v805_v40 }
 0x1d8   : > { %3031 = vst [vmem:[#allocation19_spill] sm:$0xff] %v2576_v59  ;;  %3032 = vst [vmem:[#allocation20_spill] sm:$0xff] %v2579_v53  ;;  %896 = vperm.xlu1 %1848, %v2537_v55  }
 0x1d9   : > { %1205 = vst.msk [vmem:[#allocation2 + $0x28] sm:$0xff] %vm1183_vm3, %v2576_v59  ;;  %1212 = vst.msk [vmem:[#allocation2 + $0x60] sm:$0xff] %vm1183_vm3, %v2579_v53  ;;  %v808_v39 = vpop.xlane.xlu1 %807  ;;  %v787_v40 = vpop.xlane.xlu0 %786 }
 0x1da   : > { %v2595_v33 = vmax.f32 %v2581_v7, %v808_v39  ;;  %v2598_v56 = vmax.f32 %v2583_v32, %v787_v40  ;;  %v2620_v7 = vld [vmem:[#allocation2 + $0x78] sm:$0xff]  ;;  %v1225_v39 = vld [vmem:[%s2150_s29 + $0x48] sm:$0xff]  ;;  %v1329_v32 = vsel %vm1281_vm4, %v2283_v11, 0.0  ;;  %vm1290_vm4 = vcmp.eq.s32.totalorder %v2265_v61, %v2479_v21 }
 0x1db   : > { %3041 = vst [vmem:[#allocation29_spill] sm:$0xff] %v2620_v7  ;;  %v1338_v18 = vsel %vm1290_vm4, %v2397_v25, 0.0 }
 0x1dc   : > { %3035 = vst [vmem:[#allocation23_spill] sm:$0xff] %v2595_v33  ;;  %3036 = vst [vmem:[#allocation24_spill] sm:$0xff] %v2598_v56  ;;  %946 = vperm.xlu0 %1849, %v2595_v33   ;;  %901 = vperm.xlu1 %1848, %v2559_v49  }
 0x1dd   : > { %1213 = vst.msk [vmem:[#allocation2 + $0x68] sm:$0xff] %vm1183_vm3, %v2595_v33  ;;  %1206 = vst.msk [vmem:[#allocation2 + $0x30] sm:$0xff] %vm1183_vm3, %v2598_v56  ;;  %v811_v40 = vpop.xlane.xlu0 %810  ;;  %v790_v50 = vpop.xlane.xlu1 %789  ;;  %v1231_v33 = vld [vmem:[%s2150_s29 + $0x78] sm:$0xff] }
 0x1de   : > { %v2615_v46 = vmax.f32 %v2600_v63, %v811_v40  ;;  %v2618_v54 = vmax.f32 %v2602_v0, %v790_v50 }
 0x1e0   : > { %3039 = vst [vmem:[#allocation27_spill] sm:$0xff] %v2615_v46  ;;  %3040 = vst [vmem:[#allocation28_spill] sm:$0xff] %v2618_v54  ;;  %941 = vperm.xlu1 %1848, %v2579_v53  }
 0x1e1   : > { %1214 = vst.msk [vmem:[#allocation2 + $0x70] sm:$0xff] %vm1183_vm3, %v2615_v46  ;;  %1207 = vst.msk [vmem:[#allocation2 + $0x38] sm:$0xff] %vm1183_vm3, %v2618_v54  ;;  %v814_v40 = vpop.xlane.xlu1 %813 }
 0x1e2   : > { %v2632_v50 = vmax.f32 %v2620_v7, %v814_v40  ;;  %v1227_v40 = vld [vmem:[%s2150_s29 + $0x58] sm:$0xff]  ;;  %v1337_v7 = vsel %vm1289_vm8, %v2377_v6, 0.0 }
 0x1e4   : > { %3042 = vst [vmem:[#allocation30_spill] sm:$0xff] %v2632_v50  ;;  %906 = vperm.xlu1 %1848, %v2576_v59   ;;  %1215 = vst.msk [vmem:[#allocation2 + $0x78] sm:$0xff] %vm1183_vm3, %v2632_v50 }
 0x1e8   : > { %911 = vperm.xlu1 %1848, %v2598_v56   ;;  %v1229_v56 = vld [vmem:[%s2150_s29 + $0x68] sm:$0xff] }
 0x1ec   : > { %951 = vperm.xlu1 %1848, %v2615_v46   ;;  %v1328_v46 = vsel %vm1280_vm5, %v2279_v10, 0.0  ;;  %vm1294_vm5 = vcmp.eq.s32.totalorder %v2265_v61, %v2483_v27 }
 0x1ed   : > { %v1360_v63 = vadd.f32 %v1329_v32, %v1328_v46  ;;  %v1372_v32 = vadd.f32 %v1337_v7, %v1336_v13  ;;  %v1340_v46 = vsel %vm1292_vm10, %v2415_v35, 0.0  ;;  %v1226_v7 = vld [vmem:[%s2150_s29 + $0x50] sm:$0xff]  ;;  %v1335_v13 = vsel %vm1287_vm0, %v2353_v52, 0.0 }
 0x1f0   : > { %916 = vperm.xlu1 %1848, %v2618_v54  }
 0x1f4   : > { %1260 = vperm.xlu1 %1848, %v1225_v39   ;;  %v1333_v39 = vsel %vm1285_vm6, %v2329_v38, 0.0  ;;  %vm1295_vm6 = vcmp.eq.s32.totalorder %v2267_v62, %v2483_v27 }
 0x1f8   : > { %1266 = vperm.xlu1 %1848, %v1227_v40   ;;  %v1366_v40 = vadd.f32 %v1333_v39, %v1332_v9  ;;  %v1331_v39 = vsel %vm1283_vm14, %v2314_v30, 0.0 }
 0x1f9   : > { %v1363_v9 = vadd.f32 %v1331_v39, %v1330_v20 }
 0x1fb   : > { %1361 = vadd.xlane.f32.xlu0 %v1360_v63  ;;  %v1378_v63 = vadd.f32 %v1341_v12, %v1340_v46  ;;  %v1230_v46 = vld [vmem:[%s2150_s29 + $0x70] sm:$0xff]  ;;  %v1339_v12 = vsel %vm1291_vm2, %v2401_v26, 0.0 }
 0x1fc   : > { %1272 = vperm.xlu1 %1848, %v1229_v56  }
 0x1ff   : > { %1367 = vadd.xlane.f32.xlu0 %v1366_v40  ;;  %v1228_v40 = vld [vmem:[%s2150_s29 + $0x60] sm:$0xff] }
 0x200   : > { %1278 = vperm.xlu1 %1848, %v1231_v33   ;;  %v1344_v33 = vsel %vm1296_vm13, %v2296_v19, 0.0 }
 0x201   : > { %v1384_v56 = vadd.f32 %v1345_v17, %v1344_v33  ;;  %v1342_v17 = vsel %vm1294_vm5, %v2443_v57, 0.0  ;;  %v1343_v33 = vsel %vm1295_vm6, %v2451_v1, 0.0 }
 0x202   : > { %v1381_v21 = vadd.f32 %v1343_v33, %v1342_v17 }
 0x203   : > { %1373 = vadd.xlane.f32.xlu0 %v1372_v32  ;;  %v1369_v32 = vadd.f32 %v1335_v13, %v1334_v8 }
 0x207   : > { %1379 = vadd.xlane.f32.xlu0 %v1378_v63  ;;  %v1375_v63 = vadd.f32 %v1339_v12, %v1338_v18 }
 0x20b   : > { %1385 = vadd.xlane.f32.xlu0 %v1384_v56 }
 0x221   : > { %1263 = vperm.xlu0 %1849, %v1226_v7  }
 0x224   : > { %1364 = vadd.xlane.f32.xlu1 %v1363_v9 }
 0x225   : > { %1269 = vperm.xlu0 %1849, %v1228_v40  }
 0x228   : > { %1370 = vadd.xlane.f32.xlu1 %v1369_v32 }
 0x229   : > { %1275 = vperm.xlu0 %1849, %v1230_v46  }
 0x22c   : > { %1376 = vadd.xlane.f32.xlu1 %v1375_v63 }
 0x22d   : > { %956 = vperm.xlu0 %1849, %v2632_v50  }
 0x230   : > { %1382 = vadd.xlane.f32.xlu1 %v1381_v21 }
 0x23f   : > { %v882_v9 = vpop.permute.xlu0 %881 }
 0x240   : > { %v959_v12 = vsub.f32 %v2279_v10, %v882_v9  ;;  %v960_v18 = vsub.f32 %v2283_v11, %v882_v9 }
 0x243   : > { %v922_v56 = vpop.permute.xlu1 %921  ;;  %v927_v32 = vpop.permute.xlu0 %926 }
 0x244   : > { %v975_v17 = vsub.f32 %v2296_v19, %v922_v56  ;;  %v977_v33 = vsub.f32 %v2301_v23, %v927_v32  ;;  %v976_v50 = vsub.f32 %v2290_v16, %v922_v56  ;;  %v978_v49 = vsub.f32 %v2305_v24, %v927_v32 }
 0x246   : > { %v1000_v9 = vpack.c.bf16 %v978_v49, %v976_v50 }
 0x247   : > { %v887_v7 = vpop.permute.xlu1 %886 }
 0x248   : > { %v961_v8 = vsub.f32 %v2321_v36, %v887_v7  ;;  %v962_v46 = vsub.f32 %v2314_v30, %v887_v7  ;;  %v999_v7 = vpack.c.bf16 %v977_v33, %v975_v17 }
 0x24a   : > { %v991_v21 = vpack.c.bf16 %v961_v8, %v959_v12  ;;  %v992_v54 = vpack.c.bf16 %v962_v46, %v960_v18  ;;  %v1032_v32 = vmul.bf16 1069105081, %v999_v7 }
 0x24b   : > { %v892_v39 = vpop.permute.xlu1 %891 }
 0x24c   : > { %v1008_v10 = vmul.bf16 1069105081, %v991_v21  ;;  %v963_v11 = vsub.f32 %v2325_v37, %v892_v39  ;;  %v1011_v53 = vmul.bf16 1069105081, %v992_v54  ;;  %v964_v19 = vsub.f32 %v2329_v38, %v892_v39 }
 0x24e   : > { %1882 = vpow.bf16 %v1008_v10 }
 0x24f   : > { %v2702_v20 = vpop.permute.xlu1 %931  ;;  %v2716_v59 = vpop.permute.xlu0 %936  ;;  %1884 = vpow.bf16 %v1011_v53 }
 0x250   : > { %1886 = vpow.bf16 %v1032_v32 }
 0x253   : > { %v897_v27 = vpop.permute.xlu1 %896 }
 0x254   : > { %v965_v36 = vsub.f32 %v2349_v51, %v897_v27  ;;  %v966_v0 = vsub.f32 %v2353_v52, %v897_v27  ;;  %v1035_v52 = vmul.bf16 1069105081, %v1000_v9 }
 0x256   : > { %v993_v8 = vpack.c.bf16 %v965_v36, %v963_v11  ;;  %v994_v16 = vpack.c.bf16 %v966_v0, %v964_v19  ;;  %1888 = vpow.bf16 %v1035_v52 }
 0x257   : > { %v902_v40 = vpop.permute.xlu1 %901  ;;  %v947_v49 = vpop.permute.xlu0 %946 }
 0x258   : > { %v1014_v46 = vmul.bf16 1069105081, %v993_v8  ;;  %v967_v37 = vsub.f32 %v2373_v5, %v902_v40  ;;  %v1017_v54 = vmul.bf16 1069105081, %v994_v16  ;;  %v968_v38 = vsub.f32 %v2377_v6, %v902_v40 }
 0x259   : > { %v986_v53 = vsub.f32 %v2411_v34, %v947_v49 }
 0x25a   : > { %1890 = vpow.bf16 %v1014_v46 }
 0x25b   : > { %v942_v13 = vpop.permute.xlu1 %941  ;;  %1892 = vpow.bf16 %v1017_v54 }
 0x25c   : > { %v983_v50 = vsub.f32 %v2386_v14, %v942_v13  ;;  %v984_v0 = vsub.f32 %v2390_v15, %v942_v13 }
 0x25e   : > { %v1004_v18 = vpack.c.bf16 %v986_v53, %v984_v0 }
 0x25f   : > { %v907_v63 = vpop.permute.xlu1 %906 }
 0x260   : > { %v969_v51 = vsub.f32 %v2397_v25, %v907_v63  ;;  %v970_v27 = vsub.f32 %v2401_v26, %v907_v63  ;;  %v985_v25 = vsub.f32 %v2421_v41, %v947_v49  ;;  %v1047_v11 = vmul.bf16 1069105081, %v1004_v18 }
 0x262   : > { %v995_v12 = vpack.c.bf16 %v969_v51, %v967_v37  ;;  %v996_v26 = vpack.c.bf16 %v970_v27, %v968_v38  ;;  %v1003_v5 = vpack.c.bf16 %v985_v25, %v983_v50  ;;  %v1312_v25 = vld [vmem:[#allocation4] sm:$0xff] }
 0x263   : > { %v912_v30 = vpop.permute.xlu1 %911 }
 0x264   : > { %v1020_v17 = vmul.bf16 1069105081, %v995_v12  ;;  %v1023_v40 = vmul.bf16 1069105081, %v996_v26  ;;  %v971_v36 = vsub.f32 %v2415_v35, %v912_v30  ;;  %v1044_v10 = vmul.bf16 1069105081, %v1003_v5  ;;  %v2740_v35 = vpop.eup %1882 }
 0x265   : > { %v972_v9 = vsub.f32 %v2429_v47, %v912_v30  ;;  %v2742_v16 = vpop.eup %1884  ;;  %v1055_v37 = vunpack.c.l.bf16 %v2740_v35 }
 0x266   : > { %1894 = vpow.bf16 %v1020_v17  ;;  %v2748_v27 = vpop.eup %1886  ;;  %v1056_v49 = vunpack.c.l.bf16 %v2742_v16 }
 0x267   : > { %v2718_v56 = vpop.permute.xlu1 %951  ;;  %1896 = vpow.bf16 %v1023_v40  ;;  %v2752_v54 = vpop.eup %1888  ;;  %v1314_v40 = vld [vmem:[#allocation4 + $0x10] sm:$0xff] }
 0x268   : > { %1898 = vpow.bf16 %v1044_v10  ;;  %v2754_v38 = vpop.eup %1890  ;;  %v1087_v0 = vadd.f32 %v1056_v49, %v1055_v37  ;;  %v980_v49 = vsub.f32 %v2342_v45, %v2702_v20 }
 0x269   : > { %1900 = vpow.bf16 %v1047_v11  ;;  %v2756_v50 = vpop.eup %1892  ;;  %v1061_v53 = vunpack.c.h.bf16 %v2754_v38 }
 0x26a   : > { %v1062_v26 = vunpack.c.h.bf16 %v2756_v50 }
 0x26b   : > { %v917_v39 = vpop.permute.xlu1 %916 }
 0x26c   : > { %v973_v6 = vsub.f32 %v2443_v57, %v917_v39  ;;  %v974_v13 = vsub.f32 %v2451_v1, %v917_v39 }
 0x26e   : > { %v997_v57 = vpack.c.bf16 %v973_v6, %v971_v36  ;;  %v998_v1 = vpack.c.bf16 %v974_v13, %v972_v9  ;;  %v1096_v6 = vadd.f32 %v1062_v26, %v1061_v53  ;;  %v1316_v9 = vld [vmem:[#allocation4 + $0x20] sm:$0xff] }
 0x26f   : > { %v1261_v63 = vpop.permute.xlu1 %1260 }
 0x270   : > { %vm1298_vm7 = vcmp.eq.s32.totalorder %v2265_v61, %v1261_v63  ;;  %vm1299_vm8 = vcmp.eq.s32.totalorder %v2267_v62, %v1261_v63  ;;  %v1026_v30 = vmul.bf16 1069105081, %v997_v57  ;;  %v1029_v32 = vmul.bf16 1069105081, %v998_v1 }
 0x271   : > { %v1346_v33 = vsel %vm1298_vm7, %v2301_v23, 0.0  ;;  %v1347_v21 = vsel %vm1299_vm8, %v2305_v24, 0.0 }
 0x272   : > { %v1387_v7 = vadd.f32 %v1347_v21, %v1346_v33  ;;  %1902 = vpow.bf16 %v1026_v30 }
 0x273   : > { %v1267_v19 = vpop.permute.xlu1 %1266  ;;  %1904 = vpow.bf16 %v1029_v32 }
 0x274   : > { %vm1302_vm9 = vcmp.eq.s32.totalorder %v2265_v61, %v1267_v19  ;;  %vm1303_vm10 = vcmp.eq.s32.totalorder %v2267_v62, %v1267_v19  ;;  %1388 = vadd.xlane.f32.xlu1 %v1387_v7  ;;  %v2760_v39 = vpop.eup %1894 }
 0x275   : > { %v1350_v23 = vsel %vm1302_vm9, %v2369_v4, 0.0  ;;  %v1351_v24 = vsel %vm1303_vm10, %v2362_v58, 0.0  ;;  %v2764_v5 = vpop.eup %1896  ;;  %v1065_v13 = vunpack.c.h.bf16 %v2760_v39 }
 0x276   : > { %v1393_v8 = vadd.f32 %v1351_v24, %v1350_v23  ;;  %v2766_v17 = vpop.eup %1898  ;;  %v1066_v33 = vunpack.c.h.bf16 %v2764_v5 }
 0x277   : > { %v1273_v47 = vpop.permute.xlu1 %1272  ;;  %v2770_v21 = vpop.eup %1900  ;;  %v1079_v19 = vunpack.c.l.bf16 %v2766_v17 }
 0x278   : > { %vm1306_vm11 = vcmp.eq.s32.totalorder %v2265_v61, %v1273_v47  ;;  %vm1307_vm12 = vcmp.eq.s32.totalorder %v2267_v62, %v1273_v47  ;;  %1394 = vadd.xlane.f32.xlu1 %v1393_v8  ;;  %v1102_v11 = vadd.f32 %v1066_v33, %v1065_v13  ;;  %v1080_v57 = vunpack.c.l.bf16 %v2770_v21  ;;  %v1318_v47 = vld [vmem:[#allocation4 + $0x30] sm:$0xff] }
 0x279   : > { %v1354_v51 = vsel %vm1306_vm11, %v2421_v41, 0.0  ;;  %v1355_v52 = vsel %vm1307_vm12, %v2411_v34, 0.0  ;;  %v1073_v41 = vunpack.c.h.bf16 %v2748_v27  ;;  %v1074_v34 = vunpack.c.h.bf16 %v2752_v54 }
 0x27a   : > { %v1399_v46 = vadd.f32 %v1355_v52, %v1354_v51  ;;  %v1123_v8 = vadd.f32 %v1080_v57, %v1079_v19  ;;  %v979_v52 = vsub.f32 %v2338_v44, %v2702_v20  ;;  %v987_v57 = vsub.f32 %v2425_v42, %v2718_v56 }
 0x27b   : > { %v1114_v12 = vadd.f32 %v1074_v34, %v1073_v41  ;;  %v1320_v34 = vld [vmem:[#allocation4 + $0x40] sm:$0xff] }
 0x27c   : > { %1400 = vadd.xlane.f32.xlu1 %v1399_v46  ;;  %v981_v46 = vsub.f32 %v2369_v4, %v2716_v59 }
 0x280   : > { %1088 = vadd.xlane.f32.xlu1 %v1087_v0  ;;  %v2773_v10 = vpop.eup %1902  ;;  %v982_v0 = vsub.f32 %v2362_v58, %v2716_v59 }
 0x281   : > { %v2777_v1 = vpop.eup %1904  ;;  %v1069_v30 = vunpack.c.h.bf16 %v2773_v10 }
 0x282   : > { %v1070_v32 = vunpack.c.h.bf16 %v2777_v1  ;;  %v1002_v26 = vpack.c.bf16 %v982_v0, %v980_v49 }
 0x284   : > { %1115 = vadd.xlane.f32.xlu1 %v1114_v12  ;;  %v1362_v18 = vpop.xlane.xlu0 %1361  ;;  %v1108_v41 = vadd.f32 %v1070_v32, %v1069_v30  ;;  %v1041_v4 = vmul.bf16 1069105081, %v1002_v26  ;;  %v1060_v30 = vunpack.c.l.bf16 %v2756_v50 }
 0x285   : > { %v1408_v63 = vadd.f32 %v1362_v18, %v1312_v25  ;;  %v1001_v25 = vpack.c.bf16 %v981_v46, %v979_v52 }
 0x287   : > { %1424 = vst.msk [vmem:[#allocation4] sm:$0xff] %vm1183_vm3, %v1408_v63  ;;  %v1038_v18 = vmul.bf16 1069105081, %v1001_v25 }
 0x288   : > { %1097 = vadd.xlane.f32.xlu1 %v1096_v6  ;;  %v1368_v36 = vpop.xlane.xlu0 %1367 }
 0x289   : > { %v1410_v7 = vadd.f32 %v1368_v36, %v1314_v40  ;;  %1906 = vpow.bf16 %v1038_v18  ;;  %v1057_v36 = vunpack.c.h.bf16 %v2740_v35 }
 0x28a   : > { %1908 = vpow.bf16 %v1041_v4  ;;  %v1319_v4 = vld [vmem:[#allocation4 + $0x38] sm:$0xff] }
 0x28b   : > { %1426 = vst.msk [vmem:[#allocation4 + $0x10] sm:$0xff] %vm1183_vm3, %v1410_v7  ;;  %v1058_v7 = vunpack.c.h.bf16 %v2742_v16 }
 0x28c   : > { %1103 = vadd.xlane.f32.xlu1 %v1102_v11  ;;  %v1374_v23 = vpop.xlane.xlu0 %1373 }
 0x28d   : > { %v1412_v24 = vadd.f32 %v1374_v23, %v1316_v9  ;;  %v1090_v9 = vadd.f32 %v1058_v7, %v1057_v36 }
 0x28f   : > { %1428 = vst.msk [vmem:[#allocation4 + $0x20] sm:$0xff] %vm1183_vm3, %v1412_v24 }
 0x290   : > { %1124 = vadd.xlane.f32.xlu1 %v1123_v8  ;;  %v1380_v51 = vpop.xlane.xlu0 %1379 }
 0x291   : > { %v1414_v37 = vadd.f32 %v1380_v51, %v1318_v47  ;;  %v1313_v47 = vld [vmem:[#allocation4 + $0x8] sm:$0xff] }
 0x293   : > { %1430 = vst.msk [vmem:[#allocation4 + $0x30] sm:$0xff] %vm1183_vm3, %v1414_v37  ;;  %v1315_v37 = vld [vmem:[#allocation4 + $0x18] sm:$0xff] }
 0x294   : > { %1109 = vadd.xlane.f32.xlu1 %v1108_v41  ;;  %v1386_v12 = vpop.xlane.xlu0 %1385 }
 0x295   : > { %v1416_v53 = vadd.f32 %v1386_v12, %v1320_v34 }
 0x297   : > { %1432 = vst.msk [vmem:[#allocation4 + $0x40] sm:$0xff] %vm1183_vm3, %v1416_v53  ;;  %v1907_v24 = vpop.eup %1906 }
 0x298   : > { %v1909_v32 = vpop.eup %1908  ;;  %v1075_v0 = vunpack.c.l.bf16 %v1907_v24  ;;  %v1077_v50 = vunpack.c.h.bf16 %v1907_v24  ;;  %v3045_v24 = vsub.f32 %v2523_v60, %v2537_v55 }
 0x299   : > { %v1076_v41 = vunpack.c.l.bf16 %v1909_v32  ;;  %v1078_v53 = vunpack.c.h.bf16 %v1909_v32  ;;  %v3049_v32 = vld [vmem:[#allocation20_spill] sm:$0xff] }
 0x29b   : > { %v1117_v25 = vadd.f32 %v1076_v41, %v1075_v0 }
 0x29c   : > { %v1264_v63 = vpop.permute.xlu0 %1263 }
 0x29d   : > { %vm1300_vm13 = vcmp.eq.s32.totalorder %v2265_v61, %v1264_v63  ;;  %vm1301_vm14 = vcmp.eq.s32.totalorder %v2267_v62, %v1264_v63  ;;  %v1120_v63 = vadd.f32 %v1078_v53, %v1077_v50 }
 0x29e   : > { %v1348_v58 = vsel %vm1300_vm13, %v2338_v44, 0.0  ;;  %v1349_v59 = vsel %vm1301_vm14, %v2342_v45, 0.0  ;;  %v1071_v44 = vunpack.c.l.bf16 %v2748_v27  ;;  %v1072_v45 = vunpack.c.l.bf16 %v2752_v54 }
 0x29f   : > { %v1390_v20 = vadd.f32 %v1349_v59, %v1348_v58  ;;  %v1059_v54 = vunpack.c.l.bf16 %v2754_v38  ;;  %v1317_v38 = vld [vmem:[#allocation4 + $0x28] sm:$0xff]  ;;  %v1063_v58 = vunpack.c.l.bf16 %v2760_v39  ;;  %v1064_v59 = vunpack.c.l.bf16 %v2764_v5 }
 0x2a0   : > { %v1270_v6 = vpop.permute.xlu0 %1269  ;;  %v1111_v23 = vadd.f32 %v1072_v45, %v1071_v44  ;;  %v1067_v45 = vunpack.c.l.bf16 %v2773_v10 }
 0x2a1   : > { %vm1304_vm15 = vcmp.eq.s32.totalorder %v2265_v61, %v1270_v6  ;;  %vm1305_vm0 = vcmp.eq.s32.totalorder %v2267_v62, %v1270_v6  ;;  %1391 = vadd.xlane.f32.xlu0 %v1390_v20  ;;  %v1093_v49 = vadd.f32 %v1060_v30, %v1059_v54 }
 0x2a2   : > { %v1352_v40 = vsel %vm1304_vm15, %v2386_v14, 0.0  ;;  %v1353_v13 = vsel %vm1305_vm0, %v2390_v15, 0.0  ;;  %v988_v14 = vsub.f32 %v2433_v48, %v2718_v56  ;;  %v1279_v15 = vpop.permute.xlu1 %1278 }
 0x2a3   : > { %v1396_v33 = vadd.f32 %v1353_v13, %v1352_v40  ;;  %v1081_v40 = vunpack.c.h.bf16 %v2766_v17  ;;  %v1082_v13 = vunpack.c.h.bf16 %v2770_v21  ;;  %vm1310_vm1 = vcmp.eq.s32.totalorder %v2265_v61, %v1279_v15 }
 0x2a4   : > { %v2803_v11 = vpop.permute.xlu0 %1275  ;;  %vm1311_vm2 = vcmp.eq.s32.totalorder %v2267_v62, %v1279_v15  ;;  %v1358_v21 = vsel %vm1310_vm1, %v2455_v2, 0.0 }
 0x2a5   : > { %1397 = vadd.xlane.f32.xlu0 %v1396_v33  ;;  %v1099_v33 = vadd.f32 %v1064_v59, %v1063_v58  ;;  %v1126_v39 = vadd.f32 %v1082_v13, %v1081_v40  ;;  %vm1308_vm4 = vcmp.eq.s32.totalorder %v2265_v61, %v2803_v11  ;;  %vm1309_vm5 = vcmp.eq.s32.totalorder %v2267_v62, %v2803_v11  ;;  %v1321_v11 = vld [vmem:[#allocation4 + $0x48] sm:$0xff] }
 0x2a6   : > { %v1356_v15 = vsel %vm1308_vm4, %v2425_v42, 0.0  ;;  %v3044_v61 = vsub.f32 %v2488_v31, %v2498_v43  ;;  %v853_v42 = vmul.f32 1.442695, %v3045_v24  ;;  %v1325_v31 = vld [vmem:[#allocation4 + $0x68] sm:$0xff]  ;;  %v3048_v43 = vld [vmem:[#allocation18_spill] sm:$0xff]  ;;  %v3063_v24 = vld [vmem:[#allocation12_spill] sm:$0xff] }
 0x2a8   : > { %v957_v19 = vpop.permute.xlu0 %956  ;;  %v865_v62 = vmul.f32 1.442695, %v3044_v61 }
 0x2a9   : > { %v989_v35 = vsub.f32 %v2455_v2, %v957_v19  ;;  %v990_v16 = vsub.f32 %v2459_v3, %v957_v19  ;;  %1091 = vadd.xlane.f32.xlu0 %v1090_v9  ;;  %v1068_v9 = vunpack.c.l.bf16 %v2777_v1  ;;  %v1359_v19 = vsel %vm1311_vm2, %v2459_v3, 0.0 }
 0x2aa   : > { %v1405_v10 = vadd.f32 %v1359_v19, %v1358_v21  ;;  %v1357_v2 = vsel %vm1309_vm5, %v2433_v48, 0.0  ;;  %v3054_v21 = vld [vmem:[#allocation9_spill] sm:$0xff]  ;;  %v3055_v19 = vld [vmem:[#allocation11_spill] sm:$0xff] }
 0x2ab   : > { %v1005_v8 = vpack.c.bf16 %v989_v35, %v987_v57  ;;  %v1006_v27 = vpack.c.bf16 %v990_v16, %v988_v14  ;;  %v1105_v57 = vadd.f32 %v1068_v9, %v1067_v45  ;;  %v1402_v3 = vadd.f32 %v1357_v2, %v1356_v15  ;;  %v1142_v45 = vld [vmem:[#allocation3 + $0x38] sm:$0xff]  ;;  %v3058_v15 = vld [vmem:[#allocation7_spill] sm:$0xff] }
 0x2ac   : > { %v3043_v16 = vsub.f32 %v2481_v22, %v2486_v29 }
 0x2ad   : > { %v1050_v51 = vmul.bf16 1069105081, %v1005_v8  ;;  %v1053_v52 = vmul.bf16 1069105081, %v1006_v27  ;;  %v1365_v46 = vpop.xlane.xlu1 %1364  ;;  %1112 = vadd.xlane.f32.xlu0 %v1111_v23  ;;  %v1323_v27 = vld [vmem:[#allocation4 + $0x58] sm:$0xff] }
 0x2ae   : > { %v1409_v56 = vadd.f32 %v1365_v46, %v1313_v47  ;;  %v847_v23 = vmul.f32 1.442695, %v3043_v16  ;;  %v3046_v47 = vld [vmem:[#allocation19_spill] sm:$0xff]  ;;  %v1135_v46 = vld [vmem:[#allocation3] sm:$0xff]  ;;  %v3060_v16 = vld [vmem:[#allocation8_spill] sm:$0xff] }
 0x2af   : > { %1910 = vpow.bf16 %v1050_v51  ;;  %v3047_v54 = vsub.f32 %v2561_v28, %v3046_v47  ;;  %v3050_v51 = vsub.f32 %v3048_v43, %v3049_v32  ;;  %v3052_v28 = vld [vmem:[#allocation28_spill] sm:$0xff] }
 0x2b0   : > { %1912 = vpow.bf16 %v1053_v52  ;;  %1425 = vst.msk [vmem:[#allocation4 + $0x8] sm:$0xff] %vm1183_vm3, %v1409_v56 }
 0x2b1   : > { %v1371_v34 = vpop.xlane.xlu1 %1370  ;;  %1094 = vadd.xlane.f32.xlu0 %v1093_v49  ;;  %1914 = vpow2.f32 %v847_v23  ;;  %v857_v22 = vmul.f32 1.442695, %v3047_v54  ;;  %v871_v52 = vmul.f32 1.442695, %v3050_v51  ;;  %v3061_v23 = vld [vmem:[#allocation10_spill] sm:$0xff]  ;;  %v1136_v51 = vld [vmem:[#allocation3 + $0x8] sm:$0xff] }
 0x2b2   : > { %v1411_v12 = vadd.f32 %v1371_v34, %v1315_v37  ;;  %1916 = vpow2.f32 %v865_v62  ;;  %v3051_v37 = vld [vmem:[#allocation26_spill] sm:$0xff]  ;;  %v3062_v61 = vsub.f32 %v3060_v16, %v3061_v23 }
 0x2b3   : > { %1918 = vpow2.f32 %v853_v42  ;;  %v3053_v49 = vsub.f32 %v3051_v37, %v3052_v28  ;;  %v3064_v42 = vld [vmem:[#allocation13_spill] sm:$0xff]  ;;  %v1324_v54 = vld [vmem:[#allocation4 + $0x60] sm:$0xff] }
 0x2b4   : > { %1427 = vst.msk [vmem:[#allocation4 + $0x18] sm:$0xff] %vm1183_vm3, %v1411_v12  ;;  %1920 = vpow2.f32 %v857_v22  ;;  %v851_v62 = vmul.f32 1.442695, %v3062_v61  ;;  %v3066_v22 = vld [vmem:[#allocation14_spill] sm:$0xff] }
 0x2b5   : > { %v1377_v26 = vpop.xlane.xlu1 %1376  ;;  %1118 = vadd.xlane.f32.xlu0 %v1117_v25  ;;  %1922 = vpow2.f32 %v871_v52  ;;  %v861_v0 = vmul.f32 1.442695, %v3053_v49 }
 0x2b6   : > { %v1413_v18 = vadd.f32 %v1377_v26, %v1317_v38  ;;  %v1144_v38 = vld [vmem:[#allocation3 + $0x48] sm:$0xff] }
 0x2b7   : > { %1924 = vpow2.f32 %v861_v0  ;;  %v1143_v0 = vld [vmem:[#allocation3 + $0x40] sm:$0xff] }
 0x2b8   : > { %1429 = vst.msk [vmem:[#allocation4 + $0x28] sm:$0xff] %vm1183_vm3, %v1413_v18  ;;  %v1138_v18 = vld [vmem:[#allocation3 + $0x18] sm:$0xff] }
 0x2b9   : > { %v1383_v20 = vpop.xlane.xlu1 %1382  ;;  %1121 = vadd.xlane.f32.xlu0 %v1120_v63 }
 0x2ba   : > { %v1415_v6 = vadd.f32 %v1383_v20, %v1319_v4  ;;  %v1140_v20 = vld [vmem:[#allocation3 + $0x28] sm:$0xff] }
 0x2bc   : > { %1431 = vst.msk [vmem:[#allocation4 + $0x38] sm:$0xff] %vm1183_vm3, %v1415_v6 }
 0x2bd   : > { %v1911_v36 = vpop.eup %1910  ;;  %1100 = vadd.xlane.f32.xlu0 %v1099_v33 }
 0x2be   : > { %v1913_v7 = vpop.eup %1912  ;;  %v1085_v44 = vunpack.c.h.bf16 %v1911_v36  ;;  %v1083_v14 = vunpack.c.l.bf16 %v1911_v36  ;;  %v1147_v36 = vld [vmem:[#allocation3 + $0x60] sm:$0xff] }
 0x2bf   : > { %v1086_v5 = vunpack.c.h.bf16 %v1913_v7  ;;  %v1084_v35 = vunpack.c.l.bf16 %v1913_v7  ;;  %v1915_v60 = vpop.eup %1914 }
 0x2c0   : > { %v1151_v41 = vmul.f32 %v1915_v60, %v1135_v46  ;;  %v1917_v34 = vpop.eup %1916  ;;  %v3069_v60 = vld [vmem:[#allocation15_spill] sm:$0xff] }
 0x2c1   : > { %1127 = vadd.xlane.f32.xlu0 %v1126_v39  ;;  %v1132_v17 = vadd.f32 %v1086_v5, %v1085_v44  ;;  %v1129_v1 = vadd.f32 %v1084_v35, %v1083_v14  ;;  %v1160_v50 = vmul.f32 %v1917_v34, %v1144_v38  ;;  %v1919_v53 = vpop.eup %1918  ;;  %v3073_v34 = vld [vmem:[#allocation29_spill] sm:$0xff] }
 0x2c2   : > { %v1154_v63 = vmul.f32 %v1919_v53, %v1138_v18  ;;  %v1921_v58 = vpop.eup %1920 }
 0x2c3   : > { %1133 = vadd.xlane.f32.xlu1 %v1132_v17  ;;  %v1156_v40 = vmul.f32 %v1921_v58, %v1140_v20  ;;  %v1923_v13 = vpop.eup %1922  ;;  %v1137_v58 = vld [vmem:[#allocation3 + $0x10] sm:$0xff] }
 0x2c4   : > { %v1163_v39 = vmul.f32 %v1923_v13, %v1147_v36  ;;  %v1925_v44 = vpop.eup %1924 }
 0x2c5   : > { %1106 = vadd.xlane.f32.xlu0 %v1105_v57  ;;  %v1158_v17 = vmul.f32 %v1925_v44, %v1142_v45  ;;  %v3056_v57 = vsub.f32 %v3054_v21, %v3055_v19  ;;  %v1145_v44 = vld [vmem:[#allocation3 + $0x50] sm:$0xff]  ;;  %v3080_v45 = vld [vmem:[#allocation25_spill] sm:$0xff] }
 0x2c7   : > { %1406 = vadd.xlane.f32.xlu1 %v1405_v10  ;;  %v849_v14 = vmul.f32 1.442695, %v3056_v57 }
 0x2c9   : > { %1130 = vadd.xlane.f32.xlu0 %v1129_v1  ;;  %v3057_v1 = vld [vmem:[#allocation6_spill] sm:$0xff]  ;;  %1926 = vpow2.f32 %v849_v14 }
 0x2ca   : > { %v3059_v2 = vsub.f32 %v3057_v1, %v3058_v15 }
 0x2cd   : > { %1403 = vadd.xlane.f32.xlu0 %v1402_v3  ;;  %v863_v3 = vmul.f32 1.442695, %v3059_v2 }
 0x2cf   : > { %1928 = vpow2.f32 %v863_v3  ;;  %v1139_v3 = vld [vmem:[#allocation3 + $0x20] sm:$0xff] }
 0x2d0   : > { %1930 = vpow2.f32 %v851_v62 }
 0x2d6   : > { %v1927_v43 = vpop.eup %1926 }
 0x2d7   : > { %v1152_v37 = vmul.f32 %v1927_v43, %v1136_v51 }
 0x2dc   : > { %v1929_v28 = vpop.eup %1928 }
 0x2dd   : > { %v1159_v18 = vmul.f32 %v1929_v28, %v1143_v0  ;;  %v1326_v0 = vld [vmem:[#allocation4 + $0x70] sm:$0xff] }
 0x2fd   : > { %v1389_v8 = vpop.xlane.xlu1 %1388 }
 0x2fe   : > { %v1417_v48 = vadd.f32 %v1389_v8, %v1321_v11  ;;  %v1322_v11 = vld [vmem:[#allocation4 + $0x50] sm:$0xff]  ;;  %v3065_v8 = vsub.f32 %v3063_v24, %v3064_v42 }
 0x300   : > { %1433 = vst.msk [vmem:[#allocation4 + $0x48] sm:$0xff] %vm1183_vm3, %v1417_v48  ;;  %v867_v48 = vmul.f32 1.442695, %v3065_v8  ;;  %v1150_v8 = vld [vmem:[#allocation3 + $0x78] sm:$0xff] }
 0x301   : > { %v1395_v29 = vpop.xlane.xlu1 %1394 }
 0x302   : > { %v1419_v30 = vadd.f32 %v1395_v29, %v1323_v27  ;;  %1932 = vpow2.f32 %v867_v48  ;;  %v3067_v29 = vld [vmem:[#allocation16_spill] sm:$0xff] }
 0x304   : > { %1435 = vst.msk [vmem:[#allocation4 + $0x58] sm:$0xff] %vm1183_vm3, %v1419_v30  ;;  %v3068_v30 = vsub.f32 %v3066_v22, %v3067_v29 }
 0x305   : > { %v1401_v55 = vpop.xlane.xlu1 %1400 }
 0x306   : > { %v1421_v56 = vadd.f32 %v1401_v55, %v1325_v31  ;;  %v869_v31 = vmul.f32 1.442695, %v3068_v30  ;;  %v3070_v55 = vld [vmem:[#allocation17_spill] sm:$0xff] }
 0x307   : > { %v3071_v46 = vsub.f32 %v3069_v60, %v3070_v55  ;;  %v1149_v60 = vld [vmem:[#allocation3 + $0x70] sm:$0xff] }
 0x308   : > { %1437 = vst.msk [vmem:[#allocation4 + $0x68] sm:$0xff] %vm1183_vm3, %v1421_v56  ;;  %1934 = vpow2.f32 %v869_v31 }
 0x309   : > { %v1089_v12 = vpop.xlane.xlu1 %1088  ;;  %v855_v56 = vmul.f32 1.442695, %v3071_v46 }
 0x30a   : > { %v1167_v25 = vadd.f32 %v1151_v41, %v1089_v12  ;;  %v3072_v41 = vld [vmem:[#allocation30_spill] sm:$0xff] }
 0x30b   : > { %v846_v12 = vsub.f32 %v3073_v34, %v3072_v41  ;;  %1936 = vpow2.f32 %v855_v56 }
 0x30c   : > { %1184 = vst.msk [vmem:[#allocation3] sm:$0xff] %vm1183_vm3, %v1167_v25  ;;  %v3074_v25 = vld [vmem:[#allocation21_spill] sm:$0xff] }
 0x30d   : > { %v1116_v26 = vpop.xlane.xlu1 %1115 }
 0x30e   : > { %v1176_v4 = vadd.f32 %v1160_v50, %v1116_v26  ;;  %v3075_v50 = vld [vmem:[#allocation23_spill] sm:$0xff] }
 0x30f   : > { %v3076_v53 = vsub.f32 %v3074_v25, %v3075_v50 }
 0x310   : > { %1193 = vst.msk [vmem:[#allocation3 + $0x48] sm:$0xff] %vm1183_vm3, %v1176_v4  ;;  %v1931_v4 = vpop.eup %1930 }
 0x311   : > { %v1098_v59 = vpop.xlane.xlu1 %1097  ;;  %v873_v26 = vmul.f32 1.442695, %v3076_v53  ;;  %v1153_v36 = vmul.f32 %v1931_v4, %v1137_v58 }
 0x312   : > { %v1170_v6 = vadd.f32 %v1154_v63, %v1098_v59  ;;  %v877_v59 = vmul.f32 1.442695, %v846_v12 }
 0x313   : > { %1938 = vpow2.f32 %v873_v26 }
 0x314   : > { %1187 = vst.msk [vmem:[#allocation3 + $0x18] sm:$0xff] %vm1183_vm3, %v1170_v6  ;;  %v3077_v6 = vld [vmem:[#allocation22_spill] sm:$0xff]  ;;  %1940 = vpow2.f32 %v877_v59 }
 0x315   : > { %v1104_v33 = vpop.xlane.xlu1 %1103 }
 0x316   : > { %v1172_v7 = vadd.f32 %v1156_v40, %v1104_v33  ;;  %v3078_v40 = vld [vmem:[#allocation24_spill] sm:$0xff] }
 0x317   : > { %v3079_v13 = vsub.f32 %v3077_v6, %v3078_v40 }
 0x318   : > { %1189 = vst.msk [vmem:[#allocation3 + $0x28] sm:$0xff] %vm1183_vm3, %v1172_v7  ;;  %v1933_v7 = vpop.eup %1932 }
 0x319   : > { %v1125_v5 = vpop.xlane.xlu1 %1124  ;;  %v859_v33 = vmul.f32 1.442695, %v3079_v13  ;;  %v1161_v19 = vmul.f32 %v1933_v7, %v1145_v44  ;;  %v1935_v57 = vpop.eup %1934 }
 0x31a   : > { %v1179_v9 = vadd.f32 %v1163_v39, %v1125_v5  ;;  %v1937_v15 = vpop.eup %1936 }
 0x31b   : > { %1942 = vpow2.f32 %v859_v33  ;;  %v1155_v23 = vmul.f32 %v1937_v15, %v1139_v3 }
 0x31c   : > { %1196 = vst.msk [vmem:[#allocation3 + $0x60] sm:$0xff] %vm1183_vm3, %v1179_v9  ;;  %v3081_v9 = vld [vmem:[#allocation27_spill] sm:$0xff] }
 0x31d   : > { %v1110_v35 = vpop.xlane.xlu1 %1109 }
 0x31e   : > { %v1174_v10 = vadd.f32 %v1158_v17, %v1110_v35  ;;  %v3082_v17 = vsub.f32 %v3080_v45, %v3081_v9  ;;  %v1146_v35 = vld [vmem:[#allocation3 + $0x58] sm:$0xff] }
 0x31f   : > { %v1162_v1 = vmul.f32 %v1935_v57, %v1146_v35 }
 0x320   : > { %1191 = vst.msk [vmem:[#allocation3 + $0x38] sm:$0xff] %vm1183_vm3, %v1174_v10  ;;  %v875_v21 = vmul.f32 1.442695, %v3082_v17  ;;  %v1939_v61 = vpop.eup %1938 }
 0x321   : > { %v1941_v42 = vpop.eup %1940 }
 0x322   : > { %1944 = vpow2.f32 %v875_v21  ;;  %v1166_v29 = vmul.f32 %v1941_v42, %v1150_v8 }
 0x32a   : > { %v1392_v27 = vpop.xlane.xlu0 %1391 }
 0x32b   : > { %v1418_v47 = vadd.f32 %v1392_v27, %v1322_v11  ;;  %v1148_v11 = vld [vmem:[#allocation3 + $0x68] sm:$0xff]  ;;  %v1943_v27 = vpop.eup %1942 }
 0x32c   : > { %v1164_v48 = vmul.f32 %v1939_v61, %v1148_v11 }
 0x32d   : > { %1434 = vst.msk [vmem:[#allocation4 + $0x50] sm:$0xff] %vm1183_vm3, %v1418_v47 }
 0x32e   : > { %v1398_v32 = vpop.xlane.xlu0 %1397 }
 0x32f   : > { %v1420_v52 = vadd.f32 %v1398_v32, %v1324_v54  ;;  %v1141_v54 = vld [vmem:[#allocation3 + $0x30] sm:$0xff]  ;;  %v1945_v32 = vpop.eup %1944 }
 0x330   : > { %v1157_v43 = vmul.f32 %v1943_v27, %v1141_v54 }
 0x331   : > { %1436 = vst.msk [vmem:[#allocation4 + $0x60] sm:$0xff] %vm1183_vm3, %v1420_v52  ;;  %v1327_v52 = vld [vmem:[#allocation4 + $0x78] sm:$0xff] }
 0x332   : > { %v1092_v49 = vpop.xlane.xlu0 %1091 }
 0x333   : > { %v1168_v38 = vadd.f32 %v1152_v37, %v1092_v49  ;;  %v1165_v37 = vmul.f32 %v1945_v32, %v1149_v60 }
 0x335   : > { %1185 = vst.msk [vmem:[#allocation3 + $0x8] sm:$0xff] %vm1183_vm3, %v1168_v38 }
 0x336   : > { %v1113_v63 = vpop.xlane.xlu0 %1112 }
 0x337   : > { %v1175_v20 = vadd.f32 %v1159_v18, %v1113_v63 }
 0x339   : > { %1192 = vst.msk [vmem:[#allocation3 + $0x40] sm:$0xff] %vm1183_vm3, %v1175_v20 }
 0x33a   : > { %v1095_v39 = vpop.xlane.xlu0 %1094 }
 0x33b   : > { %v1169_v5 = vadd.f32 %v1153_v36, %v1095_v39 }
 0x33d   : > { %1186 = vst.msk [vmem:[#allocation3 + $0x10] sm:$0xff] %vm1183_vm3, %v1169_v5 }
 0x33e   : > { %v1119_v14 = vpop.xlane.xlu0 %1118 }
 0x33f   : > { %v1177_v10 = vadd.f32 %v1161_v19, %v1119_v14 }
 0x341   : > { %1194 = vst.msk [vmem:[#allocation3 + $0x50] sm:$0xff] %vm1183_vm3, %v1177_v10 }
 0x342   : > { %v1122_v2 = vpop.xlane.xlu0 %1121 }
 0x343   : > { %v1178_v16 = vadd.f32 %v1162_v1, %v1122_v2 }
 0x345   : > { %1195 = vst.msk [vmem:[#allocation3 + $0x58] sm:$0xff] %vm1183_vm3, %v1178_v16 }
 0x346   : > { %v1101_v62 = vpop.xlane.xlu0 %1100 }
 0x347   : > { %v1171_v24 = vadd.f32 %v1155_v23, %v1101_v62 }
 0x349   : > { %1188 = vst.msk [vmem:[#allocation3 + $0x20] sm:$0xff] %vm1183_vm3, %v1171_v24 }
 0x34a   : > { %v1128_v47 = vpop.xlane.xlu0 %1127 }
 0x34b   : > { %v1180_v22 = vadd.f32 %v1164_v48, %v1128_v47 }
 0x34c   : > { %v1134_v30 = vpop.xlane.xlu1 %1133 }
 0x34d   : > { %1197 = vst.msk [vmem:[#allocation3 + $0x68] sm:$0xff] %vm1183_vm3, %v1180_v22  ;;  %v1182_v31 = vadd.f32 %v1166_v29, %v1134_v30 }
 0x34e   : > { %v1107_v51 = vpop.xlane.xlu0 %1106 }
 0x34f   : > { %1199 = vst.msk [vmem:[#allocation3 + $0x78] sm:$0xff] %vm1183_vm3, %v1182_v31  ;;  %v1173_v55 = vadd.f32 %v1157_v43, %v1107_v51 }
 0x350   : > { %v1407_v46 = vpop.xlane.xlu1 %1406 }
 0x351   : > { %1190 = vst.msk [vmem:[#allocation3 + $0x30] sm:$0xff] %vm1183_vm3, %v1173_v55  ;;  %v1423_v56 = vadd.f32 %v1407_v46, %v1327_v52 }
 0x352   : > { %v1131_v28 = vpop.xlane.xlu0 %1130 }
 0x353   : > { %1439 = vst.msk [vmem:[#allocation4 + $0x78] sm:$0xff] %vm1183_vm3, %v1423_v56  ;;  %v1181_v49 = vadd.f32 %v1165_v37, %v1131_v28 }
 0x355   : > { %1198 = vst.msk [vmem:[#allocation3 + $0x70] sm:$0xff] %vm1183_vm3, %v1181_v49  ;;  %1443 = sbr.rel (%p1769_p13) target bundleno = 898 (0x382), region = 82 }
 0x356   : > { %v1404_v41 = vpop.xlane.xlu0 %1403 }
 0x357   : > { %v1422_v34 = vadd.f32 %v1404_v41, %v1326_v0 }
 0x359   : > { %1438 = vst.msk [vmem:[#allocation4 + $0x70] sm:$0xff] %vm1183_vm3, %v1422_v34 }
 0x35a   : > { %v1460_v12 = vld [vmem:[#allocation3] sm:$0xff]  ;;  %v1461_v38 = vld [vmem:[#allocation3 + $0x8] sm:$0xff]  ;;  %v1462_v25 = vld [vmem:[#allocation3 + $0x10] sm:$0xff] }
 0x35b   : > { %1946 = vlog2.f32 %v1460_v12  ;;  %v1463_v50 = vld [vmem:[#allocation3 + $0x18] sm:$0xff]  ;;  %v1464_v53 = vld [vmem:[#allocation3 + $0x20] sm:$0xff]  ;;  %v1465_v26 = vld [vmem:[#allocation3 + $0x28] sm:$0xff] }
 0x35c   : > { %1948 = vlog2.f32 %v1461_v38  ;;  %v1466_v18 = vld [vmem:[#allocation3 + $0x30] sm:$0xff]  ;;  %v1467_v4 = vld [vmem:[#allocation3 + $0x38] sm:$0xff]  ;;  %v1468_v63 = vld [vmem:[#allocation3 + $0x40] sm:$0xff] }
 0x35d   : > { %1950 = vlog2.f32 %v1462_v25  ;;  %v1469_v58 = vld [vmem:[#allocation3 + $0x48] sm:$0xff]  ;;  %v1470_v59 = vld [vmem:[#allocation3 + $0x50] sm:$0xff]  ;;  %v1444_v6 = vld [vmem:[#allocation2] sm:$0xff] }
 0x35e   : > { %1952 = vlog2.f32 %v1463_v50  ;;  %v1524_v40 = vld [vmem:[%s2150_s29] sm:$0xff]  ;;  %v1445_v36 = vld [vmem:[#allocation2 + $0x8] sm:$0xff]  ;;  %v1471_v39 = vld [vmem:[#allocation3 + $0x58] sm:$0xff] }
 0x35f   : > { %1954 = vlog2.f32 %v1464_v53  ;;  %v1525_v7 = vld [vmem:[%s2150_s29 + $0x8] sm:$0xff]  ;;  %v1556_v44 = vld [vmem:[#allocation4] sm:$0xff]  ;;  %v1526_v45 = vld [vmem:[%s2150_s29 + $0x10] sm:$0xff]  ;;  %vm1540_vm6 = vcmp.ge.s32.totalorder %v1524_v40, 0 }
 0x360   : > { %1956 = vlog2.f32 %v1465_v26  ;;  %v1472_v9 = vld [vmem:[#allocation3 + $0x60] sm:$0xff]  ;;  %v1557_v19 = vld [vmem:[#allocation4 + $0x8] sm:$0xff]  ;;  %v1446_v57 = vld [vmem:[#allocation2 + $0x10] sm:$0xff]  ;;  %vm1541_vm7 = vcmp.ge.s32.totalorder %v1525_v7, 0  ;;  %vm1542_vm8 = vcmp.ge.s32.totalorder %v1526_v45, 0 }
 0x361   : > { %1958 = vlog2.f32 %v1466_v18  ;;  %v1473_v14 = vld [vmem:[#allocation3 + $0x68] sm:$0xff]  ;;  %v1447_v15 = vld [vmem:[#allocation2 + $0x18] sm:$0xff]  ;;  %v1558_v23 = vld [vmem:[#allocation4 + $0x10] sm:$0xff] }
 0x362   : > { %1960 = vlog2.f32 %v1467_v4  ;;  %v1527_v2 = vld [vmem:[%s2150_s29 + $0x18] sm:$0xff]  ;;  %v1448_v62 = vld [vmem:[#allocation2 + $0x20] sm:$0xff]  ;;  %v1474_v11 = vld [vmem:[#allocation3 + $0x70] sm:$0xff] }
 0x363   : > { %1962 = vlog2.f32 %v1468_v63  ;;  %v1559_v8 = vld [vmem:[#allocation4 + $0x18] sm:$0xff]  ;;  %v1528_v27 = vld [vmem:[%s2150_s29 + $0x20] sm:$0xff]  ;;  %vm1543_vm9 = vcmp.ge.s32.totalorder %v1527_v2, 0  ;;  %v1449_v31 = vld [vmem:[#allocation2 + $0x28] sm:$0xff] }
 0x364   : > { %1964 = vlog2.f32 %v1469_v58  ;;  %v1475_v47 = vld [vmem:[#allocation3 + $0x78] sm:$0xff]  ;;  %v1560_v30 = vld [vmem:[#allocation4 + $0x20] sm:$0xff]  ;;  %v1529_v55 = vld [vmem:[%s2150_s29 + $0x28] sm:$0xff]  ;;  %vm1544_vm10 = vcmp.ge.s32.totalorder %v1528_v27, 0 }
 0x365   : > { %1966 = vlog2.f32 %v1470_v59  ;;  %v1450_v46 = vld [vmem:[#allocation2 + $0x30] sm:$0xff]  ;;  %v1561_v49 = vld [vmem:[#allocation4 + $0x28] sm:$0xff]  ;;  %v1451_v41 = vld [vmem:[#allocation2 + $0x38] sm:$0xff]  ;;  %vm1545_vm11 = vcmp.ge.s32.totalorder %v1529_v55, 0 }
 0x366   : > { %1968 = vlog2.f32 %v1471_v39  ;;  %v1530_v56 = vld [vmem:[%s2150_s29 + $0x30] sm:$0xff]  ;;  %v1531_v53 = vld [vmem:[%s2150_s29 + $0x38] sm:$0xff]  ;;  %v1452_v58 = vld [vmem:[#allocation2 + $0x40] sm:$0xff] }
 0x367   : > { %1970 = vlog2.f32 %v1472_v9  ;;  %v1562_v25 = vld [vmem:[#allocation4 + $0x30] sm:$0xff]  ;;  %vm1546_vm12 = vcmp.ge.s32.totalorder %v1530_v56, 0  ;;  %v1563_v63 = vld [vmem:[#allocation4 + $0x38] sm:$0xff]  ;;  %v1533_v7 = vld [vmem:[%s2150_s29 + $0x48] sm:$0xff]  ;;  %vm1547_vm13 = vcmp.ge.s32.totalorder %v1531_v53, 0 }
 0x368   : > { %v1947_v20 = vpop.eup %1946  ;;  %1972 = vlog2.f32 %v1473_v14  ;;  %v1454_v9 = vld [vmem:[#allocation2 + $0x50] sm:$0xff]  ;;  %vm1549_vm15 = vcmp.ge.s32.totalorder %v1533_v7, 0  ;;  %v1539_v53 = vld [vmem:[%s2150_s29 + $0x78] sm:$0xff] }
 0x369   : > { %v1949_v13 = vpop.eup %1948  ;;  %v1477_v33 = vmul.f32 0.6931472, %v1947_v20  ;;  %1974 = vlog2.f32 %v1474_v11  ;;  %v1566_v2 = vld [vmem:[#allocation4 + $0x50] sm:$0xff] }
 0x36a   : > { %v1479_v5 = vmul.f32 0.6931472, %v1949_v13  ;;  %v1951_v17 = vpop.eup %1950  ;;  %1976 = vlog2.f32 %v1475_v47  ;;  %v1567_v47 = vld [vmem:[#allocation4 + $0x58] sm:$0xff]  ;;  %v1458_v56 = vld [vmem:[#allocation2 + $0x70] sm:$0xff] }
 0x36b   : > { %v1508_v21 = vadd.f32 %v1477_v33, %v1444_v6  ;;  %v1953_v35 = vpop.eup %1952  ;;  %v1481_v1 = vmul.f32 0.6931472, %v1951_v17  ;;  %v1532_v33 = vld [vmem:[%s2150_s29 + $0x40] sm:$0xff] }
 0x36c   : > { %v1509_v10 = vadd.f32 %v1479_v5, %v1445_v36  ;;  %v1955_v3 = vpop.eup %1954  ;;  %v1483_v61 = vmul.f32 0.6931472, %v1953_v35  ;;  %v1453_v36 = vld [vmem:[#allocation2 + $0x48] sm:$0xff]  ;;  %v1564_v5 = vld [vmem:[#allocation4 + $0x40] sm:$0xff]  ;;  %v1534_v35 = vld [vmem:[%s2150_s29 + $0x50] sm:$0xff]  ;;  %vm1548_vm14 = vcmp.ge.s32.totalorder %v1532_v33, 0 }
 0x36d   : > { %v1572_v16 = vsub.f32 %v1508_v21, %v1556_v44  ;;  %v1510_v42 = vadd.f32 %v1481_v1, %v1446_v57  ;;  %v1485_v48 = vmul.f32 0.6931472, %v1955_v3  ;;  %v1957_v54 = vpop.eup %1956  ;;  %v1565_v57 = vld [vmem:[#allocation4 + $0x48] sm:$0xff]  ;;  %v1455_v3 = vld [vmem:[#allocation2 + $0x58] sm:$0xff]  ;;  %vm1550_vm0 = vcmp.ge.s32.totalorder %v1534_v35, 0 }
 0x36e   : > { %v1573_v24 = vsub.f32 %v1509_v10, %v1557_v19  ;;  %v1511_v29 = vadd.f32 %v1483_v61, %v1447_v15  ;;  %v1959_v43 = vpop.eup %1958  ;;  %v1487_v60 = vmul.f32 0.6931472, %v1957_v54 }
 0x36f   : > { %v1588_v22 = vsel %vm1540_vm6, %v1572_v16, 0.0  ;;  %v1574_v51 = vsub.f32 %v1510_v42, %v1558_v23  ;;  %v1512_v52 = vadd.f32 %v1485_v48, %v1448_v62  ;;  %v1961_v37 = vpop.eup %1960  ;;  %v1489_v0 = vmul.f32 0.6931472, %v1959_v43  ;;  %v1456_v42 = vld [vmem:[#allocation2 + $0x60] sm:$0xff] }
 0x370   : > { %1604 = vst.msk [vmem:[%s2157_s30] sm:$0xff] %vm1183_vm3, %v1588_v22  ;;  %v1589_v32 = vsel %vm1541_vm7, %v1573_v24, 0.0  ;;  %v1575_v28 = vsub.f32 %v1511_v29, %v1559_v8  ;;  %v1513_v38 = vadd.f32 %v1487_v60, %v1449_v31  ;;  %v1491_v50 = vmul.f32 0.6931472, %v1961_v37  ;;  %v1963_v26 = vpop.eup %1962  ;;  %v1535_v24 = vld [vmem:[%s2150_s29 + $0x58] sm:$0xff]  ;;  %v1536_v8 = vld [vmem:[%s2150_s29 + $0x60] sm:$0xff] }
 0x371   : > { %1605 = vst.msk [vmem:[%s2157_s30 + $0x8] sm:$0xff] %vm1183_vm3, %v1589_v32  ;;  %v1590_v34 = vsel %vm1542_vm8, %v1574_v51, 0.0  ;;  %v1576_v12 = vsub.f32 %v1512_v52, %v1560_v30  ;;  %v1514_v4 = vadd.f32 %v1489_v0, %v1450_v46  ;;  %v1965_v59 = vpop.eup %1964  ;;  %v1493_v13 = vmul.f32 0.6931472, %v1963_v26  ;;  %v1457_v22 = vld [vmem:[#allocation2 + $0x68] sm:$0xff]  ;;  %v1568_v43 = vld [vmem:[#allocation4 + $0x60] sm:$0xff] }
 0x372   : > { %1606 = vst.msk [vmem:[%s2157_s30 + $0x10] sm:$0xff] %vm1183_vm3, %v1590_v34  ;;  %v1591_v18 = vsel %vm1543_vm9, %v1575_v28, 0.0  ;;  %v1577_v6 = vsub.f32 %v1513_v38, %v1561_v49  ;;  %v1515_v40 = vadd.f32 %v1491_v50, %v1451_v41  ;;  %v1967_v39 = vpop.eup %1966  ;;  %v1495_v45 = vmul.f32 0.6931472, %v1965_v59  ;;  %v1537_v51 = vld [vmem:[%s2150_s29 + $0x68] sm:$0xff]  ;;  %v1538_v34 = vld [vmem:[%s2150_s29 + $0x70] sm:$0xff] }
 0x373   : > { %1607 = vst.msk [vmem:[%s2157_s30 + $0x18] sm:$0xff] %vm1183_vm3, %v1591_v18  ;;  %v1592_v20 = vsel %vm1544_vm10, %v1576_v12, 0.0  ;;  %v1578_v44 = vsub.f32 %v1514_v4, %v1562_v25  ;;  %v1516_v19 = vadd.f32 %v1493_v13, %v1452_v58  ;;  %v1497_v14 = vmul.f32 0.6931472, %v1967_v39  ;;  %v1969_v10 = vpop.eup %1968  ;;  %v1569_v46 = vld [vmem:[#allocation4 + $0x68] sm:$0xff]  ;;  %v1459_v12 = vld [vmem:[#allocation2 + $0x78] sm:$0xff] }
 0x374   : > { %1608 = vst.msk [vmem:[%s2157_s30 + $0x20] sm:$0xff] %vm1183_vm3, %v1592_v20  ;;  %v1593_v17 = vsel %vm1545_vm11, %v1577_v6, 0.0  ;;  %v1579_v21 = vsub.f32 %v1515_v40, %v1563_v63  ;;  %v1517_v15 = vadd.f32 %v1495_v45, %v1453_v36  ;;  %v1971_v16 = vpop.eup %1970  ;;  %v1499_v11 = vmul.f32 0.6931472, %v1969_v10  ;;  %v1570_v25 = vld [vmem:[#allocation4 + $0x70] sm:$0xff]  ;;  %v1571_v63 = vld [vmem:[#allocation4 + $0x78] sm:$0xff] }
 0x375   : > { %1609 = vst.msk [vmem:[%s2157_s30 + $0x28] sm:$0xff] %vm1183_vm3, %v1593_v17  ;;  %v1594_v1 = vsel %vm1546_vm12, %v1578_v44, 0.0  ;;  %v1580_v61 = vsub.f32 %v1516_v19, %v1564_v5  ;;  %v1518_v62 = vadd.f32 %v1497_v14, %v1454_v9  ;;  %v1973_v48 = vpop.eup %1972  ;;  %v1501_v54 = vmul.f32 0.6931472, %v1971_v16 }
 0x376   : > { %1610 = vst.msk [vmem:[%s2157_s30 + $0x30] sm:$0xff] %vm1183_vm3, %v1594_v1  ;;  %v1595_v23 = vsel %vm1547_vm13, %v1579_v21, 0.0  ;;  %v1581_v27 = vsub.f32 %v1517_v15, %v1565_v57  ;;  %v1519_v31 = vadd.f32 %v1499_v11, %v1455_v3  ;;  %v1503_v32 = vmul.f32 0.6931472, %v1973_v48  ;;  %v1975_v52 = vpop.eup %1974 }
 0x377   : > { %1611 = vst.msk [vmem:[%s2157_s30 + $0x38] sm:$0xff] %vm1183_vm3, %v1595_v23  ;;  %v1596_v29 = vsel %vm1548_vm14, %v1580_v61, 0.0  ;;  %v1582_v30 = vsub.f32 %v1518_v62, %v1566_v2  ;;  %vm1551_vm1 = vcmp.ge.s32.totalorder %v1535_v24, 0  ;;  %v1520_v55 = vadd.f32 %v1501_v54, %v1456_v42  ;;  %v1977_v37 = vpop.eup %1976 }
 0x378   : > { %1612 = vst.msk [vmem:[%s2157_s30 + $0x40] sm:$0xff] %vm1183_vm3, %v1596_v29  ;;  %v1597_v60 = vsel %vm1549_vm15, %v1581_v27, 0.0  ;;  %vm1552_vm2 = vcmp.ge.s32.totalorder %v1536_v8, 0  ;;  %v1583_v49 = vsub.f32 %v1519_v31, %v1567_v47  ;;  %v1521_v0 = vadd.f32 %v1503_v32, %v1457_v22 }
 0x379   : > { %1613 = vst.msk [vmem:[%s2157_s30 + $0x48] sm:$0xff] %vm1183_vm3, %v1597_v60  ;;  %v1598_v28 = vsel %vm1550_vm0, %v1582_v30, 0.0  ;;  %v1505_v41 = vmul.f32 0.6931472, %v1975_v52  ;;  %v1584_v38 = vsub.f32 %v1520_v55, %v1568_v43  ;;  %vm1553_vm4 = vcmp.ge.s32.totalorder %v1537_v51, 0 }
 0x37a   : > { %1614 = vst.msk [vmem:[%s2157_s30 + $0x50] sm:$0xff] %vm1183_vm3, %v1598_v28  ;;  %v1507_v50 = vmul.f32 0.6931472, %v1977_v37  ;;  %v1599_v26 = vsel %vm1551_vm1, %v1583_v49, 0.0  ;;  %v1585_v18 = vsub.f32 %v1521_v0, %v1569_v46  ;;  %vm1554_vm5 = vcmp.ge.s32.totalorder %v1538_v34, 0 }
 0x37b   : > { %v1522_v4 = vadd.f32 %v1505_v41, %v1458_v56  ;;  %1615 = vst.msk [vmem:[%s2157_s30 + $0x58] sm:$0xff] %vm1183_vm3, %v1599_v26  ;;  %v1600_v58 = vsel %vm1552_vm2, %v1584_v38, 0.0  ;;  %vm1555_vm6 = vcmp.ge.s32.totalorder %v1539_v53, 0 }
 0x37c   : > { %v1523_v59 = vadd.f32 %v1507_v50, %v1459_v12  ;;  %1616 = vst.msk [vmem:[%s2157_s30 + $0x60] sm:$0xff] %vm1183_vm3, %v1600_v58  ;;  %v1601_v20 = vsel %vm1553_vm4, %v1585_v18, 0.0 }
 0x37d   : > { %v1586_v6 = vsub.f32 %v1522_v4, %v1570_v25  ;;  %1617 = vst.msk [vmem:[%s2157_s30 + $0x68] sm:$0xff] %vm1183_vm3, %v1601_v20 }
 0x37e   : > { %v1587_v40 = vsub.f32 %v1523_v59, %v1571_v63 }
 0x37f   : > { %v1602_v13 = vsel %vm1554_vm5, %v1586_v6, 0.0 }
 0x380   : > { %1618 = vst.msk [vmem:[%s2157_s30 + $0x70] sm:$0xff] %vm1183_vm3, %v1602_v13  ;;  %v1603_v33 = vsel %vm1555_vm6, %v1587_v40, 0.0 }
 0x381   : > { %1619 = vst.msk [vmem:[%s2157_s30 + $0x78] sm:$0xff] %vm1183_vm3, %v1603_v33 }
 0x382 PF: > { %s14_s21 = sadd.s32 1, %s2032_s21   ;;  %s3083_s15 = smov %s2012_s16 }
 0x383   : > { %p11_p0 = scmp.ge.s32.totalorder %s14_s21, 6   ;;  %s3084_s16 = smov %s2111_s26 }
 0x384   : > { %s3085_s17 = smov %s2024_s19  ;;  %s3086_s18 = smov %s2028_s20 }
 0x385   : > { %s3087_s19 = smov %s3090_s22  ;;  %s3088_s20 = smov %s3094_s23 }
 0x386   :  { %13 = sbr.rel (!%p11_p0) target bundleno = 4 (0x4), region = 126 }

</bundles_post_ra>
